<compile_context>
chip_gen: v5e
topology: v5e:2x2
jax: 0.10.0
libtpu: 0.0.40
codegen_flags: <defaults>
</compile_context>

<pallas_src>
import jax
import jax.numpy as jnp
from jax import lax
from jax.experimental import pallas as pl
from jax.experimental.pallas import tpu as pltpu

INPUT_DIM = 164
PADDED_DIM = 256          # 164 padded up to a lane-dense multiple of 128
LATENT_DIM = 128
HIDDEN_DIM = 256
HIDDEN2_DIM = HIDDEN_DIM * 2   # 512
ML_DIM = 2 * LATENT_DIM        # fused mean|logvar width (256)


def _leaky_relu(h, negative_slope=0.2):
    return jnp.where(h > 0, h, negative_slope * h)


def vae_kernel(
    # inputs (per-tile activations, resident bf16 weights / f32 biases)
    x_ref, eps_ref,
    w_ei_ref, b_ei_ref,          # encoder_input   (padded 256 -> 256)
    w_eh_ref, b_eh_ref,          # encoder_hidden  (256 -> 256)
    ln_g_ref, ln_b_ref,          # encoder_norm (LayerNorm)
    w_ml_ref, b_ml_ref,          # fused encoder_mean | encoder_logvar (256 -> 256)
    w_dh_ref, b_dh_ref,          # decoder_hidden  (128 -> 256)
    w_d2_ref, b_d2_ref,          # decoder_hidden2 (256 -> 512)
    w_do_ref, b_do_ref,          # decoder_output  (512 -> padded 256)
    # outputs
    recon_ref, ml_ref,
):
    bf16 = jnp.bfloat16
    x = x_ref[...]

    # ----- encode -----
    h = jnp.dot(x.astype(bf16), w_ei_ref[...], preferred_element_type=jnp.float32)
    h = _leaky_relu(h + b_ei_ref[...])
    h = jnp.dot(h.astype(bf16), w_eh_ref[...], preferred_element_type=jnp.float32)
    h = _leaky_relu(h + b_eh_ref[...])

    # LayerNorm over the feature axis (torch default eps = 1e-5, biased variance)
    mu = jnp.mean(h, axis=-1, keepdims=True)
    var = jnp.mean((h - mu) * (h - mu), axis=-1, keepdims=True)
    h = (h - mu) * lax.rsqrt(var + 1e-5) * ln_g_ref[...] + ln_b_ref[...]

    # fused mean | logvar projection, split at the 128-lane boundary
    ml = jnp.dot(h.astype(bf16), w_ml_ref[...], preferred_element_type=jnp.float32)
    ml = ml + b_ml_ref[...]
    mean = ml[:, :LATENT_DIM]
    logvar = jnp.clip(ml[:, LATENT_DIM:], -15.0, 15.0)

    # ----- reparameterize (f32) -----
    std = jnp.exp(0.5 * logvar)
    z = mean + eps_ref[...] * std

    # ----- decode -----
    d = jnp.dot(z.astype(bf16), w_dh_ref[...], preferred_element_type=jnp.float32)
    d = _leaky_relu(d + b_dh_ref[...])
    d = jnp.dot(d.astype(bf16), w_d2_ref[...], preferred_element_type=jnp.float32)
    d = _leaky_relu(d + b_d2_ref[...])
    recon = jnp.dot(d.astype(bf16), w_do_ref[...], preferred_element_type=jnp.float32)
    recon = recon + b_do_ref[...]

    recon_ref[...] = recon.astype(recon_ref.dtype)
    # single fused 256-lane store: [mean | clamped logvar]
    ml_ref[...] = jnp.concatenate([mean, logvar], axis=-1).astype(ml_ref.dtype)


def init_params(key, input_dim=INPUT_DIM, latent_dim=LATENT_DIM, hidden_dim=HIDDEN_DIM):
    """Mirrors VAE.weight_init(): W ~ N(0, 0.04), b = 0. Weights stored (in, out).
    LayerNorm: gamma = 1, beta = 0 (torch default)."""
    shapes = [
        ("encoder_input", input_dim, hidden_dim),
        ("encoder_hidden", hidden_dim, hidden_dim),
        ("encoder_mean", hidden_dim, latent_dim),
        ("encoder_logvar", hidden_dim, latent_dim),
        ("decoder_hidden", latent_dim, hidden_dim),
        ("decoder_hidden2", hidden_dim, hidden_dim * 2),
        ("decoder_output", hidden_dim * 2, input_dim),
    ]
    params = {}
    keys = jax.random.split(key, len(shapes))
    for k, (name, din, dout) in zip(keys, shapes):
        params[name + "_w"] = 0.04 * jax.random.normal(k, (din, dout), jnp.float32)
        params[name + "_b"] = jnp.zeros((1, dout), jnp.float32)
    params["encoder_norm_g"] = jnp.ones((1, hidden_dim), jnp.float32)
    params["encoder_norm_b"] = jnp.zeros((1, hidden_dim), jnp.float32)
    return params


def prepare_params(params):
    """One-time parameter prep (hoisted out of the per-call forward):
    pad 164->256, fuse mean|logvar projection, cast weights to bf16."""
    feat_pad = PADDED_DIM - INPUT_DIM
    w_ei = jnp.pad(params["encoder_input_w"], ((0, feat_pad), (0, 0)))   # (256, 256)
    w_do = jnp.pad(params["decoder_output_w"], ((0, 0), (0, feat_pad)))  # (512, 256)
    b_do = jnp.pad(params["decoder_output_b"], ((0, 0), (0, feat_pad)))  # (1, 256)
    w_ml = jnp.concatenate(
        [params["encoder_mean_w"], params["encoder_logvar_w"]], axis=1)  # (256, 256)
    b_ml = jnp.concatenate(
        [params["encoder_mean_b"], params["encoder_logvar_b"]], axis=1)  # (1, 256)

    bf16 = lambda a: a.astype(jnp.bfloat16)
    prepared = (
        bf16(w_ei), params["encoder_input_b"],
        bf16(params["encoder_hidden_w"]), params["encoder_hidden_b"],
        params["encoder_norm_g"], params["encoder_norm_b"],
        bf16(w_ml), b_ml,
        bf16(params["decoder_hidden_w"]), params["decoder_hidden_b"],
        bf16(params["decoder_hidden2_w"]), params["decoder_hidden2_b"],
        bf16(w_do), b_do,
    )
    return jax.tree_util.tree_map(jnp.asarray, prepared)


def _choose_tm(batch):
    """Batch tile: sublane-multiple, capped at 1024; keep >= 2 tiles when the
    batch allows it so the parallel axis spans both v7x TensorCores."""
    b8 = max(8, ((batch + 7) // 8) * 8)
    if b8 <= 8:
        return 8
    half = ((pl.cdiv(batch, 2) + 7) // 8) * 8
    return min(1024, max(8, half))


@jax.jit
def vae_forward(x, eps, prepared):
    batch, input_dim = x.shape
    assert input_dim == INPUT_DIM and eps.shape == (batch, LATENT_DIM)

    tm = _choose_tm(batch)
    batch_padded = pl.cdiv(batch, tm) * tm
    grid = (batch_padded // tm,)

    # pad activations (batch to tile multiple, features 164 -> 256)
    # TODO(synk): if the wrapper pad/slice of x/recon ever shows up at large batch,
    # move the feature zero-pad into the kernel via a pre-zeroed VMEM scratch.
    feat_pad = PADDED_DIM - INPUT_DIM
    x_p = jnp.pad(x, ((0, batch_padded - batch), (0, feat_pad)))
    eps_p = jnp.pad(eps, ((0, batch_padded - batch), (0, 0)))

    def tile_spec(width):
        return pl.BlockSpec((tm, width), lambda i: (i, 0))

    def resident_spec(arr):
        return pl.BlockSpec(arr.shape, lambda i: (0, 0))

    in_specs = [tile_spec(PADDED_DIM), tile_spec(LATENT_DIM)] + [
        resident_spec(w) for w in prepared
    ]
    out_specs = (tile_spec(PADDED_DIM), tile_spec(ML_DIM))

    # advisory cost estimate (padded dims) so XLA overlaps the surrounding ops
    matmul_terms = (
        PADDED_DIM * HIDDEN_DIM + HIDDEN_DIM * HIDDEN_DIM + HIDDEN_DIM * ML_DIM
        + LATENT_DIM * HIDDEN_DIM + HIDDEN_DIM * HIDDEN2_DIM + HIDDEN2_DIM * PADDED_DIM
    )
    weight_bytes = 2 * matmul_terms  # bf16 weights
    act_bytes = 4 * batch_padded * (PADDED_DIM + LATENT_DIM + PADDED_DIM + ML_DIM)
    cost = pl.CostEstimate(
        flops=2 * batch_padded * matmul_terms,
        transcendentals=batch_padded * (LATENT_DIM + 1),
        bytes_accessed=act_bytes + weight_bytes,
    )

    recon_p, ml = pl.pallas_call(
        vae_kernel,
        grid=grid,
        in_specs=in_specs,
        out_specs=out_specs,
        out_shape=(
            jax.ShapeDtypeStruct((batch_padded, PADDED_DIM), jnp.float32),
            jax.ShapeDtypeStruct((batch_padded, ML_DIM), jnp.float32),
        ),
        cost_estimate=cost,
        compiler_params=pltpu.CompilerParams(
            dimension_semantics=("parallel",),
            vmem_limit_bytes=32 << 20,
        ),
    )(x_p, eps_p, *prepared)

    # slice padding back off and split the fused mean|logvar output
    recon = recon_p[:batch, :INPUT_DIM]
    mean = ml[:batch, :LATENT_DIM]
    logvar = ml[:batch, LATENT_DIM:]
    return recon, mean, logvar


def _reference_forward(x, eps, params):
    """Pure-JAX f32 reference for numerical sanity checking."""
    h = x @ params["encoder_input_w"] + params["encoder_input_b"]
    h = jnp.where(h > 0, h, 0.2 * h)
    h = h @ params["encoder_hidden_w"] + params["encoder_hidden_b"]
    h = jnp.where(h > 0, h, 0.2 * h)
    mu = jnp.mean(h, axis=-1, keepdims=True)
    var = jnp.mean((h - mu) ** 2, axis=-1, keepdims=True)
    h = (h - mu) * lax.rsqrt(var + 1e-5) * params["encoder_norm_g"] + params["encoder_norm_b"]
    mean = h @ params["encoder_mean_w"] + params["encoder_mean_b"]
    logvar = jnp.clip(h @ params["encoder_logvar_w"] + params["encoder_logvar_b"], -15.0, 15.0)
    z = mean + eps * jnp.exp(0.5 * logvar)
    d = z @ params["decoder_hidden_w"] + params["decoder_hidden_b"]
    d = jnp.where(d > 0, d, 0.2 * d)
    d = d @ params["decoder_hidden2_w"] + params["decoder_hidden2_b"]
    d = jnp.where(d > 0, d, 0.2 * d)
    recon = d @ params["decoder_output_w"] + params["decoder_output_b"]
    return recon, mean, logvar


if __name__ == "__main__":
    key = jax.random.PRNGKey(0)
    k_params, k_x, k_eps = jax.random.split(key, 3)

    batch = 8
    params = init_params(k_params)
    prepared = prepare_params(params)           # one-time: pad + fuse + bf16 cast
    x = jax.random.normal(k_x, (batch, INPUT_DIM), jnp.float32)
    # eps for the reparameterization trick (torch.randn_like equivalent, drawn host-side)
    eps = jax.random.normal(k_eps, (batch, LATENT_DIM), jnp.float32)

    recon, mean, logvar = vae_forward(x, eps, prepared)
    jax.block_until_ready((recon, mean, logvar))

    assert recon.shape == (batch, INPUT_DIM)
    assert mean.shape == (batch, LATENT_DIM)
    assert logvar.shape == (batch, LATENT_DIM)

    # numerical sanity check against a pure-JAX f32 reference (bf16 MXU operands)
    r_ref, m_ref, lv_ref = _reference_forward(x, eps, params)
    assert jnp.allclose(recon, r_ref, atol=1e-2, rtol=1e-2)
    assert jnp.allclose(mean, m_ref, atol=1e-2, rtol=1e-2)
    assert jnp.allclose(logvar, lv_ref, atol=1e-2, rtol=1e-2)

    print("KERNEL_OK")
</pallas_src>

<mosaic_0001>
module attributes {stable_mosaic.version = 11 : i64} {
  func.func @vae_kernel(%arg0: i32, %arg1: memref<8x256xf32, #tpu.memory_space<vmem>>, %arg2: memref<8x128xf32, #tpu.memory_space<vmem>>, %arg3: memref<256x256xbf16, #tpu.memory_space<vmem>>, %arg4: memref<1x256xf32, #tpu.memory_space<vmem>>, %arg5: memref<256x256xbf16, #tpu.memory_space<vmem>>, %arg6: memref<1x256xf32, #tpu.memory_space<vmem>>, %arg7: memref<1x256xf32, #tpu.memory_space<vmem>>, %arg8: memref<1x256xf32, #tpu.memory_space<vmem>>, %arg9: memref<256x256xbf16, #tpu.memory_space<vmem>>, %arg10: memref<1x256xf32, #tpu.memory_space<vmem>>, %arg11: memref<128x256xbf16, #tpu.memory_space<vmem>>, %arg12: memref<1x256xf32, #tpu.memory_space<vmem>>, %arg13: memref<256x512xbf16, #tpu.memory_space<vmem>>, %arg14: memref<1x512xf32, #tpu.memory_space<vmem>>, %arg15: memref<512x256xbf16, #tpu.memory_space<vmem>>, %arg16: memref<1x256xf32, #tpu.memory_space<vmem>>, %arg17: memref<8x256xf32, #tpu.memory_space<vmem>>, %arg18: memref<8x256xf32, #tpu.memory_space<vmem>>) attributes {dimension_semantics = [#tpu.dimension_semantics<parallel>], iteration_bounds = array<i64: 1>, scalar_prefetch = 0 : i64, scratch_operands = 0 : i64, tpu.core_type = #tpu.core_type<tc>, window_params = [{transform_indices = @transform_0, window_bounds = array<i64: 8, 256>}, {transform_indices = @transform_1, window_bounds = array<i64: 8, 128>}, {pipeline_mode = #tpu.pipeline_mode<synchronous>, transform_indices = @transform_2, window_bounds = array<i64: 256, 256>}, {pipeline_mode = #tpu.pipeline_mode<synchronous>, transform_indices = @transform_3, window_bounds = array<i64: 1, 256>}, {pipeline_mode = #tpu.pipeline_mode<synchronous>, transform_indices = @transform_4, window_bounds = array<i64: 256, 256>}, {pipeline_mode = #tpu.pipeline_mode<synchronous>, transform_indices = @transform_5, window_bounds = array<i64: 1, 256>}, {pipeline_mode = #tpu.pipeline_mode<synchronous>, transform_indices = @transform_6, window_bounds = array<i64: 1, 256>}, {pipeline_mode = #tpu.pipeline_mode<synchronous>, transform_indices = @transform_7, window_bounds = array<i64: 1, 256>}, {pipeline_mode = #tpu.pipeline_mode<synchronous>, transform_indices = @transform_8, window_bounds = array<i64: 256, 256>}, {pipeline_mode = #tpu.pipeline_mode<synchronous>, transform_indices = @transform_9, window_bounds = array<i64: 1, 256>}, {pipeline_mode = #tpu.pipeline_mode<synchronous>, transform_indices = @transform_10, window_bounds = array<i64: 128, 256>}, {pipeline_mode = #tpu.pipeline_mode<synchronous>, transform_indices = @transform_11, window_bounds = array<i64: 1, 256>}, {pipeline_mode = #tpu.pipeline_mode<synchronous>, transform_indices = @transform_12, window_bounds = array<i64: 256, 512>}, {pipeline_mode = #tpu.pipeline_mode<synchronous>, transform_indices = @transform_13, window_bounds = array<i64: 1, 512>}, {pipeline_mode = #tpu.pipeline_mode<synchronous>, transform_indices = @transform_14, window_bounds = array<i64: 512, 256>}, {pipeline_mode = #tpu.pipeline_mode<synchronous>, transform_indices = @transform_15, window_bounds = array<i64: 1, 256>}, {transform_indices = @transform_16, window_bounds = array<i64: 8, 256>}, {transform_indices = @transform_17, window_bounds = array<i64: 8, 256>}]} {
    %c0 = arith.constant 0 : index
    %c0_0 = arith.constant 0 : index
    %0 = vector.load %arg1[%c0, %c0_0] : memref<8x256xf32, #tpu.memory_space<vmem>>, vector<8x256xf32>
    %1 = arith.truncf %0 : vector<8x256xf32> to vector<8x256xbf16>
    %c0_1 = arith.constant 0 : index
    %c0_2 = arith.constant 0 : index
    %2 = vector.load %arg3[%c0_1, %c0_2] : memref<256x256xbf16, #tpu.memory_space<vmem>>, vector<256x256xbf16>
    %cst = arith.constant dense<0.000000e+00> : vector<8x256xf32>
    %3 = tpu.matmul %1, %2, %cst {dimension_numbers = #tpu.dot_dimension_numbers<[1], [0], [0], [1], [0, 0, 1, 1], [], []>} : vector<8x256xbf16>, vector<256x256xbf16>, vector<8x256xf32> -> vector<8x256xf32>
    %c0_3 = arith.constant 0 : index
    %c0_4 = arith.constant 0 : index
    %4 = vector.load %arg4[%c0_3, %c0_4] : memref<1x256xf32, #tpu.memory_space<vmem>>, vector<1x256xf32>
    %5 = vector.broadcast %4 : vector<1x256xf32> to vector<8x256xf32>
    %6 = arith.addf %3, %5 : vector<8x256xf32>
    %cst_5 = arith.constant 0.000000e+00 : f32
    %7 = vector.broadcast %cst_5 : f32 to vector<8x256xf32>
    %8 = arith.cmpf ogt, %6, %7 : vector<8x256xf32>
    %cst_6 = arith.constant 2.000000e-01 : f32
    %9 = vector.broadcast %cst_6 : f32 to vector<8x256xf32>
    %10 = arith.mulf %9, %6 : vector<8x256xf32>
    %11 = arith.select %8, %6, %10 : vector<8x256xi1>, vector<8x256xf32>
    %12 = arith.truncf %11 : vector<8x256xf32> to vector<8x256xbf16>
    %c0_7 = arith.constant 0 : index
    %c0_8 = arith.constant 0 : index
    %13 = vector.load %arg5[%c0_7, %c0_8] : memref<256x256xbf16, #tpu.memory_space<vmem>>, vector<256x256xbf16>
    %cst_9 = arith.constant dense<0.000000e+00> : vector<8x256xf32>
    %14 = tpu.matmul %12, %13, %cst_9 {dimension_numbers = #tpu.dot_dimension_numbers<[1], [0], [0], [1], [0, 0, 1, 1], [], []>} : vector<8x256xbf16>, vector<256x256xbf16>, vector<8x256xf32> -> vector<8x256xf32>
    %c0_10 = arith.constant 0 : index
    %c0_11 = arith.constant 0 : index
    %15 = vector.load %arg6[%c0_10, %c0_11] : memref<1x256xf32, #tpu.memory_space<vmem>>, vector<1x256xf32>
    %16 = vector.broadcast %15 : vector<1x256xf32> to vector<8x256xf32>
    %17 = arith.addf %14, %16 : vector<8x256xf32>
    %cst_12 = arith.constant 0.000000e+00 : f32
    %18 = vector.broadcast %cst_12 : f32 to vector<8x256xf32>
    %19 = arith.cmpf ogt, %17, %18 : vector<8x256xf32>
    %cst_13 = arith.constant 2.000000e-01 : f32
    %20 = vector.broadcast %cst_13 : f32 to vector<8x256xf32>
    %21 = arith.mulf %20, %17 : vector<8x256xf32>
    %22 = arith.select %19, %17, %21 : vector<8x256xi1>, vector<8x256xf32>
    %cst_14 = arith.constant dense<0.000000e+00> : vector<8xf32>
    %23 = vector.multi_reduction <add>, %22, %cst_14 [1] : vector<8x256xf32> to vector<8xf32>
    %24 = vector.shape_cast %23 : vector<8xf32> to vector<8x1xf32>
    %cst_15 = arith.constant 2.560000e+02 : f32
    %25 = vector.broadcast %cst_15 : f32 to vector<8x1xf32>
    %26 = arith.divf %24, %25 : vector<8x1xf32>
    %27 = vector.broadcast %26 : vector<8x1xf32> to vector<8x256xf32>
    %28 = arith.subf %22, %27 : vector<8x256xf32>
    %29 = vector.broadcast %26 : vector<8x1xf32> to vector<8x256xf32>
    %30 = arith.subf %22, %29 : vector<8x256xf32>
    %31 = arith.mulf %28, %30 : vector<8x256xf32>
    %cst_16 = arith.constant dense<0.000000e+00> : vector<8xf32>
    %32 = vector.multi_reduction <add>, %31, %cst_16 [1] : vector<8x256xf32> to vector<8xf32>
    %33 = vector.shape_cast %32 : vector<8xf32> to vector<8x1xf32>
    %cst_17 = arith.constant 2.560000e+02 : f32
    %34 = vector.broadcast %cst_17 : f32 to vector<8x1xf32>
    %35 = arith.divf %33, %34 : vector<8x1xf32>
    %36 = vector.broadcast %26 : vector<8x1xf32> to vector<8x256xf32>
    %37 = arith.subf %22, %36 : vector<8x256xf32>
    %cst_18 = arith.constant 9.99999974E-6 : f32
    %38 = vector.broadcast %cst_18 : f32 to vector<8x1xf32>
    %39 = arith.addf %35, %38 : vector<8x1xf32>
    %40 = math.rsqrt %39 : vector<8x1xf32>
    %41 = vector.broadcast %40 : vector<8x1xf32> to vector<8x256xf32>
    %42 = arith.mulf %37, %41 : vector<8x256xf32>
    %c0_19 = arith.constant 0 : index
    %c0_20 = arith.constant 0 : index
    %43 = vector.load %arg7[%c0_19, %c0_20] : memref<1x256xf32, #tpu.memory_space<vmem>>, vector<1x256xf32>
    %44 = vector.broadcast %43 : vector<1x256xf32> to vector<8x256xf32>
    %45 = arith.mulf %42, %44 : vector<8x256xf32>
    %c0_21 = arith.constant 0 : index
    %c0_22 = arith.constant 0 : index
    %46 = vector.load %arg8[%c0_21, %c0_22] : memref<1x256xf32, #tpu.memory_space<vmem>>, vector<1x256xf32>
    %47 = vector.broadcast %46 : vector<1x256xf32> to vector<8x256xf32>
    %48 = arith.addf %45, %47 : vector<8x256xf32>
    %49 = arith.truncf %48 : vector<8x256xf32> to vector<8x256xbf16>
    %c0_23 = arith.constant 0 : index
    %c0_24 = arith.constant 0 : index
    %50 = vector.load %arg9[%c0_23, %c0_24] : memref<256x256xbf16, #tpu.memory_space<vmem>>, vector<256x256xbf16>
    %cst_25 = arith.constant dense<0.000000e+00> : vector<8x256xf32>
    %51 = tpu.matmul %49, %50, %cst_25 {dimension_numbers = #tpu.dot_dimension_numbers<[1], [0], [0], [1], [0, 0, 1, 1], [], []>} : vector<8x256xbf16>, vector<256x256xbf16>, vector<8x256xf32> -> vector<8x256xf32>
    %c0_26 = arith.constant 0 : index
    %c0_27 = arith.constant 0 : index
    %52 = vector.load %arg10[%c0_26, %c0_27] : memref<1x256xf32, #tpu.memory_space<vmem>>, vector<1x256xf32>
    %53 = vector.broadcast %52 : vector<1x256xf32> to vector<8x256xf32>
    %54 = arith.addf %51, %53 : vector<8x256xf32>
    %55 = vector.extract_strided_slice %54 {offsets = [0, 0], sizes = [8, 128], strides = [1, 1]} : vector<8x256xf32> to vector<8x128xf32>
    %56 = vector.extract_strided_slice %54 {offsets = [0, 128], sizes = [8, 128], strides = [1, 1]} : vector<8x256xf32> to vector<8x128xf32>
    %cst_28 = arith.constant -1.500000e+01 : f32
    %cst_29 = arith.constant 1.500000e+01 : f32
    %57 = vector.broadcast %cst_28 : f32 to vector<8x128xf32>
    %58 = arith.maximumf %57, %56 : vector<8x128xf32>
    %59 = vector.broadcast %cst_29 : f32 to vector<8x128xf32>
    %60 = arith.minimumf %59, %58 : vector<8x128xf32>
    %cst_30 = arith.constant 5.000000e-01 : f32
    %61 = vector.broadcast %cst_30 : f32 to vector<8x128xf32>
    %62 = arith.mulf %61, %60 : vector<8x128xf32>
    %63 = math.exp %62 : vector<8x128xf32>
    %c0_31 = arith.constant 0 : index
    %c0_32 = arith.constant 0 : index
    %64 = vector.load %arg2[%c0_31, %c0_32] : memref<8x128xf32, #tpu.memory_space<vmem>>, vector<8x128xf32>
    %65 = arith.mulf %64, %63 : vector<8x128xf32>
    %66 = arith.addf %55, %65 : vector<8x128xf32>
    %67 = arith.truncf %66 : vector<8x128xf32> to vector<8x128xbf16>
    %c0_33 = arith.constant 0 : index
    %c0_34 = arith.constant 0 : index
    %68 = vector.load %arg11[%c0_33, %c0_34] : memref<128x256xbf16, #tpu.memory_space<vmem>>, vector<128x256xbf16>
    %cst_35 = arith.constant dense<0.000000e+00> : vector<8x256xf32>
    %69 = tpu.matmul %67, %68, %cst_35 {dimension_numbers = #tpu.dot_dimension_numbers<[1], [0], [0], [1], [0, 0, 1, 1], [], []>} : vector<8x128xbf16>, vector<128x256xbf16>, vector<8x256xf32> -> vector<8x256xf32>
    %c0_36 = arith.constant 0 : index
    %c0_37 = arith.constant 0 : index
    %70 = vector.load %arg12[%c0_36, %c0_37] : memref<1x256xf32, #tpu.memory_space<vmem>>, vector<1x256xf32>
    %71 = vector.broadcast %70 : vector<1x256xf32> to vector<8x256xf32>
    %72 = arith.addf %69, %71 : vector<8x256xf32>
    %cst_38 = arith.constant 0.000000e+00 : f32
    %73 = vector.broadcast %cst_38 : f32 to vector<8x256xf32>
    %74 = arith.cmpf ogt, %72, %73 : vector<8x256xf32>
    %cst_39 = arith.constant 2.000000e-01 : f32
    %75 = vector.broadcast %cst_39 : f32 to vector<8x256xf32>
    %76 = arith.mulf %75, %72 : vector<8x256xf32>
    %77 = arith.select %74, %72, %76 : vector<8x256xi1>, vector<8x256xf32>
    %78 = arith.truncf %77 : vector<8x256xf32> to vector<8x256xbf16>
    %c0_40 = arith.constant 0 : index
    %c0_41 = arith.constant 0 : index
    %79 = vector.load %arg13[%c0_40, %c0_41] : memref<256x512xbf16, #tpu.memory_space<vmem>>, vector<256x512xbf16>
    %cst_42 = arith.constant dense<0.000000e+00> : vector<8x512xf32>
    %80 = tpu.matmul %78, %79, %cst_42 {dimension_numbers = #tpu.dot_dimension_numbers<[1], [0], [0], [1], [0, 0, 1, 1], [], []>} : vector<8x256xbf16>, vector<256x512xbf16>, vector<8x512xf32> -> vector<8x512xf32>
    %c0_43 = arith.constant 0 : index
    %c0_44 = arith.constant 0 : index
    %81 = vector.load %arg14[%c0_43, %c0_44] : memref<1x512xf32, #tpu.memory_space<vmem>>, vector<1x512xf32>
    %82 = vector.broadcast %81 : vector<1x512xf32> to vector<8x512xf32>
    %83 = arith.addf %80, %82 : vector<8x512xf32>
    %cst_45 = arith.constant 0.000000e+00 : f32
    %84 = vector.broadcast %cst_45 : f32 to vector<8x512xf32>
    %85 = arith.cmpf ogt, %83, %84 : vector<8x512xf32>
    %cst_46 = arith.constant 2.000000e-01 : f32
    %86 = vector.broadcast %cst_46 : f32 to vector<8x512xf32>
    %87 = arith.mulf %86, %83 : vector<8x512xf32>
    %88 = arith.select %85, %83, %87 : vector<8x512xi1>, vector<8x512xf32>
    %89 = arith.truncf %88 : vector<8x512xf32> to vector<8x512xbf16>
    %c0_47 = arith.constant 0 : index
    %c0_48 = arith.constant 0 : index
    %90 = vector.load %arg15[%c0_47, %c0_48] : memref<512x256xbf16, #tpu.memory_space<vmem>>, vector<512x256xbf16>
    %cst_49 = arith.constant dense<0.000000e+00> : vector<8x256xf32>
    %91 = tpu.matmul %89, %90, %cst_49 {dimension_numbers = #tpu.dot_dimension_numbers<[1], [0], [0], [1], [0, 0, 1, 1], [], []>} : vector<8x512xbf16>, vector<512x256xbf16>, vector<8x256xf32> -> vector<8x256xf32>
    %c0_50 = arith.constant 0 : index
    %c0_51 = arith.constant 0 : index
    %92 = vector.load %arg16[%c0_50, %c0_51] : memref<1x256xf32, #tpu.memory_space<vmem>>, vector<1x256xf32>
    %93 = vector.broadcast %92 : vector<1x256xf32> to vector<8x256xf32>
    %94 = arith.addf %91, %93 : vector<8x256xf32>
    %c0_52 = arith.constant 0 : index
    %c0_53 = arith.constant 0 : index
    %95 = vector.load %arg17[%c0_52, %c0_53] : memref<8x256xf32, #tpu.memory_space<vmem>>, vector<8x256xf32>
    tpu.vector_store %arg17[%c0_52, %c0_53], %94 {strides = array<i32>} : memref<8x256xf32, #tpu.memory_space<vmem>>, vector<8x256xf32>,
    %96 = tpu.concatenate %55, %60 in 1 : vector<8x128xf32>, vector<8x128xf32> -> vector<8x256xf32>
    %c0_54 = arith.constant 0 : index
    %c0_55 = arith.constant 0 : index
    %97 = vector.load %arg18[%c0_54, %c0_55] : memref<8x256xf32, #tpu.memory_space<vmem>>, vector<8x256xf32>
    tpu.vector_store %arg18[%c0_54, %c0_55], %96 {strides = array<i32>} : memref<8x256xf32, #tpu.memory_space<vmem>>, vector<8x256xf32>,
    return
  }
  func.func @transform_0(%arg0: i32) -> (i32, i32) {
    %c0_i32 = arith.constant 0 : i32
    %c0_i32_0 = arith.constant 0 : i32
    return %arg0, %c0_i32 : i32, i32
  }
  func.func @transform_1(%arg0: i32) -> (i32, i32) {
    %c0_i32 = arith.constant 0 : i32
    %c0_i32_0 = arith.constant 0 : i32
    return %arg0, %c0_i32 : i32, i32
  }
  func.func @transform_2(%arg0: i32) -> (i32, i32) {
    %c0_i32 = arith.constant 0 : i32
    %c0_i32_0 = arith.constant 0 : i32
    %c0_i32_1 = arith.constant 0 : i32
    return %c0_i32, %c0_i32_0 : i32, i32
  }
  func.func @transform_3(%arg0: i32) -> (i32, i32) {
    %c0_i32 = arith.constant 0 : i32
    %c0_i32_0 = arith.constant 0 : i32
    %c0_i32_1 = arith.constant 0 : i32
    return %c0_i32, %c0_i32_0 : i32, i32
  }
  func.func @transform_4(%arg0: i32) -> (i32, i32) {
    %c0_i32 = arith.constant 0 : i32
    %c0_i32_0 = arith.constant 0 : i32
    %c0_i32_1 = arith.constant 0 : i32
    return %c0_i32, %c0_i32_0 : i32, i32
  }
  func.func @transform_5(%arg0: i32) -> (i32, i32) {
    %c0_i32 = arith.constant 0 : i32
    %c0_i32_0 = arith.constant 0 : i32
    %c0_i32_1 = arith.constant 0 : i32
    return %c0_i32, %c0_i32_0 : i32, i32
  }
  func.func @transform_6(%arg0: i32) -> (i32, i32) {
    %c0_i32 = arith.constant 0 : i32
    %c0_i32_0 = arith.constant 0 : i32
    %c0_i32_1 = arith.constant 0 : i32
    return %c0_i32, %c0_i32_0 : i32, i32
  }
  func.func @transform_7(%arg0: i32) -> (i32, i32) {
    %c0_i32 = arith.constant 0 : i32
    %c0_i32_0 = arith.constant 0 : i32
    %c0_i32_1 = arith.constant 0 : i32
    return %c0_i32, %c0_i32_0 : i32, i32
  }
  func.func @transform_8(%arg0: i32) -> (i32, i32) {
    %c0_i32 = arith.constant 0 : i32
    %c0_i32_0 = arith.constant 0 : i32
    %c0_i32_1 = arith.constant 0 : i32
    return %c0_i32, %c0_i32_0 : i32, i32
  }
  func.func @transform_9(%arg0: i32) -> (i32, i32) {
    %c0_i32 = arith.constant 0 : i32
    %c0_i32_0 = arith.constant 0 : i32
    %c0_i32_1 = arith.constant 0 : i32
    return %c0_i32, %c0_i32_0 : i32, i32
  }
  func.func @transform_10(%arg0: i32) -> (i32, i32) {
    %c0_i32 = arith.constant 0 : i32
    %c0_i32_0 = arith.constant 0 : i32
    %c0_i32_1 = arith.constant 0 : i32
    return %c0_i32, %c0_i32_0 : i32, i32
  }
  func.func @transform_11(%arg0: i32) -> (i32, i32) {
    %c0_i32 = arith.constant 0 : i32
    %c0_i32_0 = arith.constant 0 : i32
    %c0_i32_1 = arith.constant 0 : i32
    return %c0_i32, %c0_i32_0 : i32, i32
  }
  func.func @transform_12(%arg0: i32) -> (i32, i32) {
    %c0_i32 = arith.constant 0 : i32
    %c0_i32_0 = arith.constant 0 : i32
    %c0_i32_1 = arith.constant 0 : i32
    return %c0_i32, %c0_i32_0 : i32, i32
  }
  func.func @transform_13(%arg0: i32) -> (i32, i32) {
    %c0_i32 = arith.constant 0 : i32
    %c0_i32_0 = arith.constant 0 : i32
    %c0_i32_1 = arith.constant 0 : i32
    return %c0_i32, %c0_i32_0 : i32, i32
  }
  func.func @transform_14(%arg0: i32) -> (i32, i32) {
    %c0_i32 = arith.constant 0 : i32
    %c0_i32_0 = arith.constant 0 : i32
    %c0_i32_1 = arith.constant 0 : i32
    return %c0_i32, %c0_i32_0 : i32, i32
  }
  func.func @transform_15(%arg0: i32) -> (i32, i32) {
    %c0_i32 = arith.constant 0 : i32
    %c0_i32_0 = arith.constant 0 : i32
    %c0_i32_1 = arith.constant 0 : i32
    return %c0_i32, %c0_i32_0 : i32, i32
  }
  func.func @transform_16(%arg0: i32) -> (i32, i32) {
    %c0_i32 = arith.constant 0 : i32
    %c0_i32_0 = arith.constant 0 : i32
    return %arg0, %c0_i32 : i32, i32
  }
  func.func @transform_17(%arg0: i32) -> (i32, i32) {
    %c0_i32 = arith.constant 0 : i32
    %c0_i32_0 = arith.constant 0 : i32
    return %arg0, %c0_i32 : i32, i32
  }
}

</mosaic_0001>

<bundles_post_ra>
// kernel: vae_forward.1
= control target key start
LH: loop header
LB: loop body
LE: loop exit
PB: predicated region body
PF: predicated region fallthrough
CT: control target
= control target key end

     0   :  { %s3759_s0 = inlined_call_operand.vmem [shape: f32[8,256], index: 0, kind: input, shape index: {}]   ;;  %s3760_s1 = inlined_call_operand.vmem [shape: f32[8,128], index: 1, kind: input, shape index: {}]   ;;  %s3761_s2 = inlined_call_operand.hbm [shape: bf16[256,256], index: 2, kind: input, shape index: {}]   ;;  %s3762_s3 = inlined_call_operand.vmem [shape: f32[1,256], index: 3, kind: input, shape index: {}]   ;;  %s3763_s4 = inlined_call_operand.hbm [shape: bf16[256,256], index: 4, kind: input, shape index: {}]   ;;  %s3764_s5 = inlined_call_operand.vmem [shape: f32[1,256], index: 5, kind: input, shape index: {}]   ;;  %s3765_s6 = inlined_call_operand.vmem [shape: f32[1,256], index: 6, kind: input, shape index: {}]   ;;  %s3766_s7 = inlined_call_operand.vmem [shape: f32[1,256], index: 7, kind: input, shape index: {}]   ;;  %s3767_s8 = inlined_call_operand.hbm [shape: bf16[256,256], index: 8, kind: input, shape index: {}]   ;;  %s3768_s9 = inlined_call_operand.vmem [shape: f32[1,256], index: 9, kind: input, shape index: {}]   ;;  %s3769_s10 = inlined_call_operand.hbm [shape: bf16[128,256], index: 10, kind: input, shape index: {}]   ;;  %s3770_s11 = inlined_call_operand.vmem [shape: f32[1,256], index: 11, kind: input, shape index: {}]   ;;  %s3771_s12 = inlined_call_operand.hbm [shape: bf16[256,512], index: 12, kind: input, shape index: {}]   ;;  %s3772_s13 = inlined_call_operand.vmem [shape: f32[1,512], index: 13, kind: input, shape index: {}]   ;;  %s3773_s14 = inlined_call_operand.hbm [shape: bf16[512,256], index: 14, kind: input, shape index: {}]   ;;  %s3774_s15 = inlined_call_operand.vmem [shape: f32[1,256], index: 15, kind: input, shape index: {}]   ;;  %s3775_s16 = inlined_call_operand.hbm [shape: f32[8,256], index: 16, kind: output, shape index: {0}]   ;;  %s3776_s17 = inlined_call_operand.vmem [shape: f32[8,256], index: 17, kind: output, shape index: {1}]  }
   0x1   :  { %3778 = sst [smem:[#allocation19_spill]] %s3759_s0 }
   0x2   :  { %3779 = sst [smem:[#allocation20_spill]] %s3760_s1 }
   0x3   :  { %23 = vsyncpa [#allocation3], 0 }
   0x4   :  { %24 = vsyncpa [#allocation6], 0 }
   0x5   :  { %25 = vsyncpa [#allocation9], 0 }
   0x6   :  { %26 = vsyncpa [#allocation12], 0 }
   0x7   :  { %27 = vsyncpa [#allocation4], 0  ;;  %s51_s26 = sshll.u32 %s3763_s4, 4  ;;  %s3546_s27 = smov [#allocation5]   ;;  %s52_s26 = int_to_ptr.hbm [resolvable:$true] %s51_s26 }
   0x8   :  { %s53_s28 = sshll.u32 %s3546_s27, 4  ;;  %s85_s30 = sshll.u32 %s3769_s10, 4  ;;  %s54_s28 = int_to_ptr.vmem [resolvable:$true] %s53_s28  ;;  %s86_s30 = int_to_ptr.hbm [resolvable:$true] %s85_s30 }
   0x9   :  { %s3547_s18 = smov 128   ;;  %s3548_s19 = smov 8  }
   0xa   :  { %59 = dma.hbm_to_vmem [thread:$0]  %s52_s26, 4096, %s54_s28, [#allocation6], %s3547_s18, %s3547_s18, %s3548_s19  }
   0xb   :  { %s3549_s1 = smov [#allocation8]   ;;  %s36_s4 = sshll.u32 %s3761_s2, 4  ;;  %s37_s4 = int_to_ptr.hbm [resolvable:$true] %s36_s4 }
   0xc   :  { %s87_s20 = sshll.u32 %s3549_s1, 4  ;;  %s70_s24 = sshll.u32 %s3767_s8, 4  ;;  %s88_s20 = int_to_ptr.vmem [resolvable:$true] %s87_s20  ;;  %s71_s24 = int_to_ptr.hbm [resolvable:$true] %s70_s24 }
   0xd   :  { %93 = dma.hbm_to_vmem [thread:$0]  %s86_s30, 2048, %s88_s20, [#allocation9], %s3547_s18, %s3547_s18, %s3548_s19  }
   0xe   :  { %s3550_s25 = smov [#allocation2]   ;;  %s3551_s26 = smov [#allocation7]  }
   0xf   :  { %s38_s27 = sshll.u32 %s3550_s25, 4  ;;  %s72_s2 = sshll.u32 %s3551_s26, 4  ;;  %s39_s27 = int_to_ptr.vmem [resolvable:$true] %s38_s27  ;;  %s73_s2 = int_to_ptr.vmem [resolvable:$true] %s72_s2 }
  0x10   :  { %44 = dma.hbm_to_vmem [thread:$0]  %s37_s4, 4096, %s39_s27, [#allocation3], %s3547_s18, %s3547_s18, %s3548_s19  }
  0x11   :  { %s100_s0 = sshll.u32 %s3771_s12, 4  ;;  %s3552_s8 = smov [#allocation10]   ;;  %s101_s0 = int_to_ptr.hbm [resolvable:$true] %s100_s0 }
  0x12   :  { %78 = dma.hbm_to_vmem [thread:$0]  %s71_s24, 4096, %s73_s2, [#allocation6], %s3547_s18, %s3547_s18, %s3548_s19  }
  0x13   :  { %s102_s30 = sshll.u32 %s3552_s8, 4  ;;  %s115_s21 = sshll.u32 %s3773_s14, 4  ;;  %s103_s30 = int_to_ptr.vmem [resolvable:$true] %s102_s30  ;;  %s116_s21 = int_to_ptr.hbm [resolvable:$true] %s115_s21 }
  0x14   :  { %s3553_s22 = smov 256   ;;  %s3554_s4 = smov 16  }
  0x15   :  { %108 = dma.hbm_to_vmem [thread:$0]  %s101_s0, 8192, %s103_s30, [#allocation9], %s3553_s22, %s3553_s22, %s3554_s4  }
  0x16   :  { %s3555_s10 = smov [#allocation11]  }
  0x17   :  { %s117_s23 = sshll.u32 %s3555_s10, 4  ;;  %s118_s23 = int_to_ptr.vmem [resolvable:$true] %s117_s23 }
  0x18   :  { %123 = dma.hbm_to_vmem [thread:$0]  %s116_s21, 8192, %s118_s23, [#allocation12], %s3547_s18, %s3547_s18, %s3548_s19  }
  0x19   :  { %3536 = dma.done.wait [#allocation3], 4096  }
  0x1a   :  { %3537 = vsyncadd [#allocation3], 4294963200 }
  0x1b   :  { %3538 = dma.done.wait [#allocation6], 8192  }
  0x1c   :  { %3539 = vsyncadd [#allocation6], 4294959104 }
  0x1d   :  { %3540 = dma.done.wait [#allocation9], 10240  }
  0x1e   :  { %3541 = vsyncadd [#allocation9], 4294957056 }
  0x1f   :  { %3542 = dma.done.wait [#allocation12], 8192  }
  0x20   :  { %3543 = vsyncadd [#allocation12], 4294959104  ;;  %v2207_v0 = vld [vmem:[#allocation2 + $0x70] sm:$0xf]  ;;  %v3125_v1 = vld [vmem:[#allocation2 + $0x74] sm:$0xf0] }
  0x21   :  { %v2271_v2 = vld [vmem:[#allocation2 + $0xf0] sm:$0xf]  ;;  %v2208_v3 = vor.u32 %v3125_v1, %v2207_v0  ;;  %v3141_v4 = vld [vmem:[#allocation2 + $0xf4] sm:$0xf0]  ;;  %v3124_v5 = vld [vmem:[#allocation2 + $0x74] sm:$0xf] }
  0x22   :  { %v2209_v6 = vld [vmem:[#allocation2 + $0x78] sm:$0xf0]  ;;  %v2272_v7 = vor.u32 %v3141_v4, %v2271_v2  ;;  %v3140_v9 = vld [vmem:[#allocation2 + $0xf4] sm:$0xf]  ;;  %v2199_v11 = vld [vmem:[#allocation2 + $0x60] sm:$0xf] }
  0x23   :  { %v2212_v8 = vor.u32 %v3124_v5, %v2209_v6  ;;  %v2273_v10 = vld [vmem:[#allocation2 + $0xf8] sm:$0xf0]  ;;  %352 = vmatpush.bf16.msra.mxu0 %v2208_v3  ;;  %v3123_v13 = vld [vmem:[#allocation2 + $0x64] sm:$0xf0]  ;;  %v2263_v14 = vld [vmem:[#allocation2 + $0xe0] sm:$0xf] }
  0x24   :  { %v2276_v12 = vor.u32 %v3140_v9, %v2273_v10  ;;  %v3139_v15 = vld [vmem:[#allocation2 + $0xe4] sm:$0xf0]  ;;  %365 = vmatpush.bf16.msra.mxu1 %v2272_v7  ;;  %v2200_v16 = vor.u32 %v3123_v13, %v2199_v11  ;;  %v3122_v18 = vld [vmem:[#allocation2 + $0x64] sm:$0xf]  ;;  %v2201_v19 = vld [vmem:[#allocation2 + $0x68] sm:$0xf0] }
  0x25   :  { %378 = vmatpush.bf16.msra.mxu2 %v2212_v8  ;;  %v2264_v17 = vor.u32 %v3139_v15, %v2263_v14  ;;  %v3138_v20 = vld [vmem:[#allocation2 + $0xe4] sm:$0xf]  ;;  %v2204_v21 = vor.u32 %v3122_v18, %v2201_v19  ;;  %v2265_v22 = vld [vmem:[#allocation2 + $0xe8] sm:$0xf0]  ;;  %v2191_v23 = vld [vmem:[#allocation2 + $0x50] sm:$0xf] }
  0x26   :  { %391 = vmatpush.bf16.msra.mxu3 %v2276_v12  ;;  %v3121_v24 = vld [vmem:[#allocation2 + $0x54] sm:$0xf0]  ;;  %v2268_v25 = vor.u32 %v3138_v20, %v2265_v22  ;;  %v2255_v26 = vld [vmem:[#allocation2 + $0xd0] sm:$0xf]  ;;  %v3120_v28 = vld [vmem:[#allocation2 + $0x54] sm:$0xf] }
  0x27   :  { %v3137_v27 = vld [vmem:[#allocation2 + $0xd4] sm:$0xf0]  ;;  %353 = vmatpush.bf16.msra.mxu0 %v2200_v16  ;;  %v2192_v29 = vor.u32 %v3121_v24, %v2191_v23  ;;  %v2193_v30 = vld [vmem:[#allocation2 + $0x58] sm:$0xf0]  ;;  %v3136_v31 = vld [vmem:[#allocation2 + $0xd4] sm:$0xf] }
  0x28   :  { %v2257_v32 = vld [vmem:[#allocation2 + $0xd8] sm:$0xf0]  ;;  %366 = vmatpush.bf16.msra.mxu1 %v2264_v17  ;;  %v2256_v33 = vor.u32 %v3137_v27, %v2255_v26  ;;  %v2196_v34 = vor.u32 %v3120_v28, %v2193_v30  ;;  %v2183_v35 = vld [vmem:[#allocation2 + $0x40] sm:$0xf]  ;;  %v3119_v36 = vld [vmem:[#allocation2 + $0x44] sm:$0xf0] }
  0x29   :  { %379 = vmatpush.bf16.msra.mxu2 %v2204_v21  ;;  %v2247_v37 = vld [vmem:[#allocation2 + $0xc0] sm:$0xf]  ;;  %v2260_v38 = vor.u32 %v3136_v31, %v2257_v32  ;;  %v3135_v39 = vld [vmem:[#allocation2 + $0xc4] sm:$0xf0]  ;;  %v3118_v40 = vld [vmem:[#allocation2 + $0x44] sm:$0xf]  ;;  %v2184_v44 = vor.u32 %v3119_v36, %v2183_v35 }
  0x2a   :  { %392 = vmatpush.bf16.msra.mxu3 %v2268_v25  ;;  %v2185_v41 = vld [vmem:[#allocation2 + $0x48] sm:$0xf0]  ;;  %v3134_v42 = vld [vmem:[#allocation2 + $0xc4] sm:$0xf]  ;;  %v2248_v45 = vor.u32 %v3135_v39, %v2247_v37  ;;  %v2175_v47 = vld [vmem:[#allocation2 + $0x30] sm:$0xf] }
  0x2b   :  { %v2249_v43 = vld [vmem:[#allocation2 + $0xc8] sm:$0xf0]  ;;  %354 = vmatpush.bf16.msra.mxu0 %v2192_v29  ;;  %v2188_v46 = vor.u32 %v3118_v40, %v2185_v41  ;;  %v3117_v48 = vld [vmem:[#allocation2 + $0x34] sm:$0xf0]  ;;  %v2239_v49 = vld [vmem:[#allocation2 + $0xb0] sm:$0xf] }
  0x2c   :  { %367 = vmatpush.bf16.msra.mxu1 %v2256_v33  ;;  %v2252_v50 = vor.u32 %v3134_v42, %v2249_v43  ;;  %v3133_v51 = vld [vmem:[#allocation2 + $0xb4] sm:$0xf0]  ;;  %v3116_v52 = vld [vmem:[#allocation2 + $0x34] sm:$0xf]  ;;  %v2177_v53 = vld [vmem:[#allocation2 + $0x38] sm:$0xf0]  ;;  %v2176_v56 = vor.u32 %v3117_v48, %v2175_v47 }
  0x2d   :  { %380 = vmatpush.bf16.msra.mxu2 %v2196_v34  ;;  %v3132_v54 = vld [vmem:[#allocation2 + $0xb4] sm:$0xf]  ;;  %v2241_v55 = vld [vmem:[#allocation2 + $0xb8] sm:$0xf0]  ;;  %v2240_v57 = vor.u32 %v3133_v51, %v2239_v49  ;;  %v2180_v58 = vor.u32 %v3116_v52, %v2177_v53  ;;  %v2167_v59 = vld [vmem:[#allocation2 + $0x20] sm:$0xf] }
  0x2e   :  { %393 = vmatpush.bf16.msra.mxu3 %v2260_v38  ;;  %v3115_v60 = vld [vmem:[#allocation2 + $0x24] sm:$0xf0]  ;;  %v2231_v61 = vld [vmem:[#allocation2 + $0xa0] sm:$0xf]  ;;  %v2244_v62 = vor.u32 %v3132_v54, %v2241_v55  ;;  %v3114_v0 = vld [vmem:[#allocation2 + $0x24] sm:$0xf] }
  0x2f   :  { %355 = vmatpush.bf16.msra.mxu0 %v2184_v44  ;;  %v3131_v63 = vld [vmem:[#allocation2 + $0xa4] sm:$0xf0]  ;;  %v2169_v1 = vld [vmem:[#allocation2 + $0x28] sm:$0xf0]  ;;  %v3130_v2 = vld [vmem:[#allocation2 + $0xa4] sm:$0xf]  ;;  %v2168_v4 = vor.u32 %v3115_v60, %v2167_v59 }
  0x30   :  { %368 = vmatpush.bf16.msra.mxu1 %v2248_v45  ;;  %v2233_v3 = vld [vmem:[#allocation2 + $0xa8] sm:$0xf0]  ;;  %v2232_v5 = vor.u32 %v3131_v63, %v2231_v61  ;;  %v2172_v6 = vor.u32 %v3114_v0, %v2169_v1  ;;  %v2159_v7 = vld [vmem:[#allocation2 + $0x10] sm:$0xf]  ;;  %v3113_v8 = vld [vmem:[#allocation2 + $0x14] sm:$0xf0] }
  0x31   :  { %381 = vmatpush.bf16.msra.mxu2 %v2188_v46  ;;  %v2223_v9 = vld [vmem:[#allocation2 + $0x90] sm:$0xf]  ;;  %v2236_v10 = vor.u32 %v3130_v2, %v2233_v3  ;;  %v3129_v11 = vld [vmem:[#allocation2 + $0x94] sm:$0xf0]  ;;  %v3112_v12 = vld [vmem:[#allocation2 + $0x14] sm:$0xf]  ;;  %v2160_v16 = vor.u32 %v3113_v8, %v2159_v7 }
  0x32   :  { %394 = vmatpush.bf16.msra.mxu3 %v2252_v50  ;;  %v2161_v13 = vld [vmem:[#allocation2 + $0x18] sm:$0xf0]  ;;  %v3128_v14 = vld [vmem:[#allocation2 + $0x94] sm:$0xf]  ;;  %v2151_v17 = vld [vmem:[#allocation2] sm:$0xf]  ;;  %v2224_v18 = vor.u32 %v3129_v11, %v2223_v9 }
  0x33   :  { %356 = vmatpush.bf16.msra.mxu0 %v2176_v56  ;;  %v2225_v15 = vld [vmem:[#allocation2 + $0x98] sm:$0xf0]  ;;  %v2164_v19 = vor.u32 %v3112_v12, %v2161_v13  ;;  %v3111_v20 = vld [vmem:[#allocation2 + $0x4] sm:$0xf0]  ;;  %v2215_v21 = vld [vmem:[#allocation2 + $0x80] sm:$0xf] }
  0x34   :  { %369 = vmatpush.bf16.msra.mxu1 %v2240_v57  ;;  %v3127_v22 = vld [vmem:[#allocation2 + $0x84] sm:$0xf0]  ;;  %v2228_v23 = vor.u32 %v3128_v14, %v2225_v15  ;;  %v3110_v24 = vld [vmem:[#allocation2 + $0x4] sm:$0xf]  ;;  %v2153_v25 = vld [vmem:[#allocation2 + $0x8] sm:$0xf0]  ;;  %v2152_v30 = vor.u32 %v3111_v20, %v2151_v17 }
  0x35   :  { %382 = vmatpush.bf16.msra.mxu2 %v2180_v58  ;;  %v3126_v26 = vld [vmem:[#allocation2 + $0x84] sm:$0xf]  ;;  %v2217_v27 = vld [vmem:[#allocation2 + $0x88] sm:$0xf0]  ;;  %v2335_v28 = vld [vmem:[#allocation5 + $0x70] sm:$0xf]  ;;  %v2216_v34 = vor.u32 %v3127_v22, %v2215_v21  ;;  %v2156_v35 = vor.u32 %v3110_v24, %v2153_v25 }
  0x36   :  { %395 = vmatpush.bf16.msra.mxu3 %v2244_v62  ;;  %v3157_v29 = vld [vmem:[#allocation5 + $0x74] sm:$0xf0]  ;;  %s3780_s18 = sld [smem:[#allocation19_spill]]  ;;  %v3156_v32 = vld [vmem:[#allocation5 + $0x74] sm:$0xf]  ;;  %v2220_v37 = vor.u32 %v3126_v26, %v2217_v27 }
  0x37   :  { %357 = vmatpush.bf16.msra.mxu0 %v2168_v4  ;;  %v2337_v33 = vld [vmem:[#allocation5 + $0x78] sm:$0xf0]  ;;  %v2336_v38 = vor.u32 %v3157_v29, %v2335_v28  ;;  %v2327_v39 = vld [vmem:[#allocation5 + $0x60] sm:$0xf]  ;;  %v2399_v40 = vld [vmem:[#allocation5 + $0xf0] sm:$0xf] }
  0x38   :  { %370 = vmatpush.bf16.msra.mxu1 %v2232_v5  ;;  %v3173_v41 = vld [vmem:[#allocation5 + $0xf4] sm:$0xf0]  ;;  %v2340_v43 = vor.u32 %v3156_v32, %v2337_v33  ;;  %v3155_v44 = vld [vmem:[#allocation5 + $0x64] sm:$0xf0]  ;;  %v3172_v45 = vld [vmem:[#allocation5 + $0xf4] sm:$0xf] }
  0x39   :  { %383 = vmatpush.bf16.msra.mxu2 %v2172_v6  ;;  %v2401_v46 = vld [vmem:[#allocation5 + $0xf8] sm:$0xf0]  ;;  %v3154_v48 = vld [vmem:[#allocation5 + $0x64] sm:$0xf]  ;;  %v2329_v49 = vld [vmem:[#allocation5 + $0x68] sm:$0xf0]  ;;  %v2400_v50 = vor.u32 %v3173_v41, %v2399_v40  ;;  %v2328_v51 = vor.u32 %v3155_v44, %v2327_v39 }
  0x3a   :  { %396 = vmatpush.bf16.msra.mxu3 %v2236_v10  ;;  %v2404_v52 = vor.u32 %v3172_v45, %v2401_v46  ;;  %v2319_v53 = vld [vmem:[#allocation5 + $0x50] sm:$0xf]  ;;  %v2391_v54 = vld [vmem:[#allocation5 + $0xe0] sm:$0xf]  ;;  %v3171_v55 = vld [vmem:[#allocation5 + $0xe4] sm:$0xf0]  ;;  %v2332_v56 = vor.u32 %v3154_v48, %v2329_v49 }
  0x3b   :  { %358 = vmatpush.bf16.msra.mxu0 %v2160_v16  ;;  %v3153_v57 = vld [vmem:[#allocation5 + $0x54] sm:$0xf0]  ;;  %v3170_v58 = vld [vmem:[#allocation5 + $0xe4] sm:$0xf]  ;;  %v2393_v59 = vld [vmem:[#allocation5 + $0xe8] sm:$0xf0]  ;;  %v2392_v62 = vor.u32 %v3171_v55, %v2391_v54 }
  0x3c   :  { %v150_v31 = vld [vmem:[%s3780_s18] sm:$0xff]  ;;  %371 = vmatpush.bf16.msra.mxu1 %v2224_v18  ;;  %v151_v36 = vld [vmem:[%s3780_s18 + $0x8] sm:$0xff]  ;;  %v3152_v60 = vld [vmem:[#allocation5 + $0x54] sm:$0xf]  ;;  %v2320_v63 = vor.u32 %v3153_v57, %v2319_v53  ;;  %v2396_v0 = vor.u32 %v3170_v58, %v2393_v59  ;;  %s3781_s20 = sld [smem:[#allocation20_spill]]  ;;  %s2132_s18 = sshll.u32 %s3775_s16, 4  ;;  %s2133_s18 = int_to_ptr.hbm [resolvable:$true] %s2132_s18 }
  0x3d   :  { %384 = vmatpush.bf16.msra.mxu2 %v2164_v19  ;;  %v152_v42 = vpack.c.bf16 %v150_v31, %v150_v31  ;;  %v153_v47 = vpack.c.bf16 %v151_v36, %v151_v36  ;;  %v2321_v61 = vld [vmem:[#allocation5 + $0x58] sm:$0xf0]  ;;  %v2311_v1 = vld [vmem:[#allocation5 + $0x40] sm:$0xf]  ;;  %v2383_v2 = vld [vmem:[#allocation5 + $0xd0] sm:$0xf] }
  0x3e   :  { %397 = vmatpush.bf16.msra.mxu3 %v2228_v23  ;;  %v3169_v3 = vld [vmem:[#allocation5 + $0xd4] sm:$0xf0]  ;;  %v2324_v4 = vor.u32 %v3152_v60, %v2321_v61  ;;  %v3151_v5 = vld [vmem:[#allocation5 + $0x44] sm:$0xf0]  ;;  %v3168_v6 = vld [vmem:[#allocation5 + $0xd4] sm:$0xf] }
  0x3f   :  { %359 = vmatpush.bf16.msra.mxu0 %v2152_v30  ;;  %v2385_v7 = vld [vmem:[#allocation5 + $0xd8] sm:$0xf0]  ;;  %v3150_v8 = vld [vmem:[#allocation5 + $0x44] sm:$0xf]  ;;  %v2313_v9 = vld [vmem:[#allocation5 + $0x48] sm:$0xf0]  ;;  %v2384_v10 = vor.u32 %v3169_v3, %v2383_v2  ;;  %v2312_v11 = vor.u32 %v3151_v5, %v2311_v1 }
  0x40   :  { %372 = vmatpush.bf16.msra.mxu1 %v2216_v34  ;;  %v2388_v12 = vor.u32 %v3168_v6, %v2385_v7  ;;  %v2303_v13 = vld [vmem:[#allocation5 + $0x30] sm:$0xf]  ;;  %v2375_v14 = vld [vmem:[#allocation5 + $0xc0] sm:$0xf]  ;;  %v3167_v15 = vld [vmem:[#allocation5 + $0xc4] sm:$0xf0]  ;;  %v2316_v16 = vor.u32 %v3150_v8, %v2313_v9 }
  0x41   :  { %385 = vmatpush.bf16.msra.mxu2 %v2156_v35  ;;  %v3149_v17 = vld [vmem:[#allocation5 + $0x34] sm:$0xf0]  ;;  %v3166_v18 = vld [vmem:[#allocation5 + $0xc4] sm:$0xf]  ;;  %v2377_v19 = vld [vmem:[#allocation5 + $0xc8] sm:$0xf0]  ;;  %v2376_v22 = vor.u32 %v3167_v15, %v2375_v14 }
  0x42   :  { %398 = vmatpush.bf16.msra.mxu3 %v2220_v37  ;;  %360 = vmatmul.bf16.vlgmr.msra.gmra.mxu0 %v152_v42  ;;  %v3148_v20 = vld [vmem:[#allocation5 + $0x34] sm:$0xf]  ;;  %v2305_v21 = vld [vmem:[#allocation5 + $0x38] sm:$0xf0]  ;;  %v2304_v23 = vor.u32 %v3149_v17, %v2303_v13  ;;  %v2380_v24 = vor.u32 %v3166_v18, %v2377_v19  ;;  %v2295_v26 = vld [vmem:[#allocation5 + $0x20] sm:$0xf] }
  0x43   :  { %610 = vmatpush.bf16.msrb.mxu0 %v2336_v38  ;;  %373 = vmatmul.bf16.vlgmr.msra.gmra.mxu1 %v153_v47  ;;  %v2308_v25 = vor.u32 %v3148_v20, %v2305_v21  ;;  %v3147_v27 = vld [vmem:[#allocation5 + $0x24] sm:$0xf0]  ;;  %v3146_v28 = vld [vmem:[#allocation5 + $0x24] sm:$0xf]  ;;  %v2297_v29 = vld [vmem:[#allocation5 + $0x28] sm:$0xf0] }
  0x44   :  { %386 = vmatmul.bf16.vlgmr.msra.gmra.mxu2 %v152_v42  ;;  %623 = vmatpush.bf16.msrb.mxu1 %v2400_v50  ;;  %v2296_v30 = vor.u32 %v3147_v27, %v2295_v26  ;;  %v2300_v31 = vor.u32 %v3146_v28, %v2297_v29  ;;  %v2367_v32 = vld [vmem:[#allocation5 + $0xb0] sm:$0xf]  ;;  %v3165_v33 = vld [vmem:[#allocation5 + $0xb4] sm:$0xf0]  ;;  %v3164_v34 = vld [vmem:[#allocation5 + $0xb4] sm:$0xf] }
  0x45   :  { %636 = vmatpush.bf16.msrb.mxu2 %v2340_v43  ;;  %399 = vmatmul.bf16.vlgmr.msra.gmra.mxu3 %v153_v47  ;;  %v2368_v35 = vor.u32 %v3165_v33, %v2367_v32  ;;  %v2369_v36 = vld [vmem:[#allocation5 + $0xb8] sm:$0xf0]  ;;  %v2287_v38 = vld [vmem:[#allocation5 + $0x10] sm:$0xf]  ;;  %v3145_v39 = vld [vmem:[#allocation5 + $0x14] sm:$0xf0] }
  0x46   :  { %649 = vmatpush.bf16.msrb.mxu3 %v2404_v52  ;;  %v2372_v37 = vor.u32 %v3164_v34, %v2369_v36  ;;  %v3144_v40 = vld [vmem:[#allocation5 + $0x14] sm:$0xf]  ;;  %v2288_v41 = vor.u32 %v3145_v39, %v2287_v38  ;;  %v2289_v42 = vld [vmem:[#allocation5 + $0x18] sm:$0xf0]  ;;  %v2359_v44 = vld [vmem:[#allocation5 + $0xa0] sm:$0xf] }
  0x47   :  { %611 = vmatpush.bf16.msrb.mxu0 %v2328_v51  ;;  %v2292_v43 = vor.u32 %v3144_v40, %v2289_v42  ;;  %v3163_v45 = vld [vmem:[#allocation5 + $0xa4] sm:$0xf0]  ;;  %v3162_v46 = vld [vmem:[#allocation5 + $0xa4] sm:$0xf]  ;;  %v2361_v48 = vld [vmem:[#allocation5 + $0xa8] sm:$0xf0] }
  0x48   :  { %624 = vmatpush.bf16.msrb.mxu1 %v2392_v62  ;;  %v2360_v47 = vor.u32 %v3163_v45, %v2359_v44  ;;  %v2364_v49 = vor.u32 %v3162_v46, %v2361_v48  ;;  %v2279_v50 = vld [vmem:[#allocation5] sm:$0xf]  ;;  %v3143_v51 = vld [vmem:[#allocation5 + $0x4] sm:$0xf0]  ;;  %v3142_v52 = vld [vmem:[#allocation5 + $0x4] sm:$0xf] }
  0x49   :  { %637 = vmatpush.bf16.msrb.mxu2 %v2332_v56  ;;  %v2280_v53 = vor.u32 %v3143_v51, %v2279_v50  ;;  %v2281_v54 = vld [vmem:[#allocation5 + $0x8] sm:$0xf0]  ;;  %v2351_v56 = vld [vmem:[#allocation5 + $0x90] sm:$0xf]  ;;  %v3161_v57 = vld [vmem:[#allocation5 + $0x94] sm:$0xf0] }
  0x4a   :  { %650 = vmatpush.bf16.msrb.mxu3 %v2396_v0  ;;  %v2284_v55 = vor.u32 %v3142_v52, %v2281_v54  ;;  %v3160_v58 = vld [vmem:[#allocation5 + $0x94] sm:$0xf]  ;;  %v2352_v59 = vor.u32 %v3161_v57, %v2351_v56  ;;  %v2353_v60 = vld [vmem:[#allocation5 + $0x98] sm:$0xf0]  ;;  %v2343_v62 = vld [vmem:[#allocation5 + $0x80] sm:$0xf] }
  0x4b   :  { %612 = vmatpush.bf16.msrb.mxu0 %v2320_v63  ;;  %v2356_v61 = vor.u32 %v3160_v58, %v2353_v60  ;;  %v3159_v63 = vld [vmem:[#allocation5 + $0x84] sm:$0xf0]  ;;  %v3158_v0 = vld [vmem:[#allocation5 + $0x84] sm:$0xf]  ;;  %v2345_v2 = vld [vmem:[#allocation5 + $0x88] sm:$0xf0] }
  0x4c   :  { %625 = vmatpush.bf16.msrb.mxu1 %v2384_v10  ;;  %v2344_v1 = vor.u32 %v3159_v63, %v2343_v62  ;;  %v2348_v3 = vor.u32 %v3158_v0, %v2345_v2  ;;  %v444_v26 = vld [vmem:[%s3764_s5] sm:$0x3]  ;;  %v3556_v45 = vmov 256.0   ;;  %v2463_v46 = vld [vmem:[#allocation7 + $0x70] sm:$0xf] }
  0x4d   :  { %638 = vmatpush.bf16.msrb.mxu2 %v2324_v4  ;;  %v186_v4 = vld [vmem:[%s3762_s3] sm:$0x3]  ;;  %v446_v27 = vperm.slane %v444_v26, 0  ;;  %3362 = vrcp.f32 %v3556_v45  ;;  %v2527_v48 = vld [vmem:[#allocation7 + $0xf0] sm:$0xf] }
  0x4e   :  { %651 = vmatpush.bf16.msrb.mxu3 %v2388_v12  ;;  %v188_v5 = vperm.slane %v186_v4, 0  ;;  %v189_v10 = vperm.slane %v186_v4, 1  ;;  %v3205_v50 = vld [vmem:[#allocation7 + $0xf4] sm:$0xf0]  ;;  %v3188_v51 = vld [vmem:[#allocation7 + $0x74] sm:$0xf] }
  0x4f   :  { %613 = vmatpush.bf16.msrb.mxu0 %v2312_v11  ;;  %v2465_v52 = vld [vmem:[#allocation7 + $0x78] sm:$0xf0]  ;;  %v2528_v54 = vor.u32 %v3205_v50, %v2527_v48  ;;  %v3204_v56 = vld [vmem:[#allocation7 + $0xf4] sm:$0xf]  ;;  %v2495_v45 = vld [vmem:[#allocation7 + $0xb0] sm:$0xf] }
  0x50   :  { %626 = vmatpush.bf16.msrb.mxu1 %v2376_v22  ;;  %v2529_v57 = vld [vmem:[#allocation7 + $0xf8] sm:$0xf0]  ;;  %v3180_v48 = vld [vmem:[#allocation7 + $0x34] sm:$0xf] }
  0x51   :  { %639 = vmatpush.bf16.msrb.mxu2 %v2316_v16  ;;  %v2532_v58 = vor.u32 %v3204_v56, %v2529_v57  ;;  %v3179_v56 = vld [vmem:[#allocation7 + $0x24] sm:$0xf0]  ;;  %v2487_v57 = vld [vmem:[#allocation7 + $0xa0] sm:$0xf] }
  0x52   :  { %652 = vmatpush.bf16.msrb.mxu3 %v2380_v24 }
  0x53   :  { %614 = vmatpush.bf16.msrb.mxu0 %v2304_v23 }
  0x54   :  { %627 = vmatpush.bf16.msrb.mxu1 %v2368_v35 }
  0x55   :  { %640 = vmatpush.bf16.msrb.mxu2 %v2308_v25 }
  0x56   :  { %653 = vmatpush.bf16.msrb.mxu3 %v2372_v37 }
  0x57   :  { %615 = vmatpush.bf16.msrb.mxu0 %v2296_v30 }
  0x58   :  { %628 = vmatpush.bf16.msrb.mxu1 %v2360_v47  ;;  %v3189_v47 = vld [vmem:[#allocation7 + $0x74] sm:$0xf0] }
  0x59   :  { %641 = vmatpush.bf16.msrb.mxu2 %v2300_v31  ;;  %v447_v31 = vperm.slane %v444_v26, 1 }
  0x5a   :  { %654 = vmatpush.bf16.msrb.mxu3 %v2364_v49  ;;  %v2464_v49 = vor.u32 %v3189_v47, %v2463_v46  ;;  %v3197_v47 = vld [vmem:[#allocation7 + $0xb4] sm:$0xf0] }
  0x5b   :  { %616 = vmatpush.bf16.msrb.mxu0 %v2288_v41  ;;  %v2496_v50 = vor.u32 %v3197_v47, %v2495_v45 }
  0x5c   :  { %629 = vmatpush.bf16.msrb.mxu1 %v2352_v59 }
  0x5d   :  { %642 = vmatpush.bf16.msrb.mxu2 %v2292_v43 }
  0x5e   :  { %655 = vmatpush.bf16.msrb.mxu3 %v2356_v61 }
  0x5f   :  { %617 = vmatpush.bf16.msrb.mxu0 %v2280_v53  ;;  %v3363_v53 = vpop.eup %3362 }
  0x60   :  { %630 = vmatpush.bf16.msrb.mxu1 %v2344_v1  ;;  %v672_v59 = vmul.f32 256.0, %v3363_v53  ;;  %vm676_vm4 = vweird.f32 %v3363_v53 }
  0x61   :  { %643 = vmatpush.bf16.msrb.mxu2 %v2284_v55  ;;  %v2468_v55 = vor.u32 %v3188_v51, %v2465_v52  ;;  %v3196_v52 = vld [vmem:[#allocation7 + $0xb4] sm:$0xf] }
  0x62   :  { %656 = vmatpush.bf16.msrb.mxu3 %v2348_v3  ;;  %v673_v60 = vsub.f32 1.0, %v672_v59  ;;  %v3195_v59 = vld [vmem:[#allocation7 + $0xa4] sm:$0xf0] }
  0x63   :  { %916 = vmatpush.bf16.msra.mxu0 %v2464_v49  ;;  %v2433_v49 = vld [vmem:[#allocation7 + $0x38] sm:$0xf0] }
  0x64   :  { %929 = vmatpush.bf16.msra.mxu1 %v2528_v54  ;;  %v674_v61 = vmul.f32 %v3363_v53, %v673_v60  ;;  %v2436_v51 = vor.u32 %v3180_v48, %v2433_v49  ;;  %v3178_v60 = vld [vmem:[#allocation7 + $0x24] sm:$0xf] }
  0x65   :  { %942 = vmatpush.bf16.msra.mxu2 %v2468_v55  ;;  %v2423_v55 = vld [vmem:[#allocation7 + $0x20] sm:$0xf] }
  0x66   :  { %955 = vmatpush.bf16.msra.mxu3 %v2532_v58  ;;  %v675_v62 = vadd.f32 %v3363_v53, %v674_v61  ;;  %v2424_v58 = vor.u32 %v3179_v56, %v2423_v55  ;;  %v2425_v61 = vld [vmem:[#allocation7 + $0x28] sm:$0xf0] }
  0x68   :  { %v3693_v63 = vsel %vm676_vm4, %v3363_v53, %v675_v62  ;;  %v2497_v53 = vld [vmem:[#allocation7 + $0xb8] sm:$0xf0]  ;;  %v2488_v62 = vor.u32 %v3195_v59, %v2487_v57  ;;  %v2584_v59 = vld [vmem:[#allocation8 + $0x60] sm:$0xf] }
  0x69   :  { %v2500_v54 = vor.u32 %v3196_v52, %v2497_v53 }
  0xbf   :  { %v361_v6 = vpop.f32.mrf.mxu0 }
  0xc0   :  { %v362_v7 = vadd.f32 %v361_v6, %v188_v5  ;;  %v374_v8 = vpop.f32.mrf.mxu1 }
  0xc2   :  { %v375_v9 = vadd.f32 %v374_v8, %v362_v7  ;;  %v2455_v7 = vld [vmem:[#allocation7 + $0x60] sm:$0xf]  ;;  %v3187_v8 = vld [vmem:[#allocation7 + $0x64] sm:$0xf0] }
  0xc4   :  { %vm404_vm0 = vcmp.gt.f32.partialorder %v375_v9, 0.0  ;;  %v406_v11 = vmul.f32 0.2, %v375_v9 }
  0xc6   :  { %v408_v13 = vsel %vm404_vm0, %v375_v9, %v406_v11  ;;  %v2519_v9 = vld [vmem:[#allocation7 + $0xe0] sm:$0xf]  ;;  %v3203_v11 = vld [vmem:[#allocation7 + $0xe4] sm:$0xf0] }
  0xc7   :  { %v387_v12 = vpop.f32.mrf.mxu2  ;;  %v363_v16 = vpop.f32.mrf.mxu0  ;;  %v410_v17 = vpack.c.bf16 %v408_v13, %v408_v13  ;;  %v2457_v13 = vld [vmem:[#allocation7 + $0x68] sm:$0xf0] }
  0xc8   :  { %v388_v14 = vadd.f32 %v387_v12, %v189_v10  ;;  %v400_v15 = vpop.f32.mrf.mxu3  ;;  %v376_v18 = vpop.f32.mrf.mxu1  ;;  %v2456_v10 = vor.u32 %v3187_v8, %v2455_v7  ;;  %v3186_v12 = vld [vmem:[#allocation7 + $0x64] sm:$0xf]  ;;  %v3177_v7 = vld [vmem:[#allocation7 + $0x14] sm:$0xf0]  ;;  %v2479_v8 = vld [vmem:[#allocation7 + $0x90] sm:$0xf] }
  0xc9   :  { %618 = vmatmul.bf16.vlgmr.msrb.gmra.mxu0 %v410_v17  ;;  %644 = vmatmul.bf16.vlgmr.msrb.gmra.mxu2 %v410_v17  ;;  %v3202_v16 = vld [vmem:[#allocation7 + $0xe4] sm:$0xf]  ;;  %v2521_v17 = vld [vmem:[#allocation7 + $0xe8] sm:$0xf0] }
  0xca   :  { %v401_v19 = vadd.f32 %v400_v15, %v388_v14  ;;  %v2520_v14 = vor.u32 %v3203_v11, %v2519_v9  ;;  %v2460_v15 = vor.u32 %v3186_v12, %v2457_v13  ;;  %917 = vmatpush.bf16.msra.mxu0 %v2456_v10  ;;  %v2524_v18 = vor.u32 %v3202_v16, %v2521_v17  ;;  %v3193_v10 = vld [vmem:[#allocation7 + $0x94] sm:$0xf0]  ;;  %v3176_v11 = vld [vmem:[#allocation7 + $0x14] sm:$0xf]  ;;  %v2417_v12 = vld [vmem:[#allocation7 + $0x18] sm:$0xf0] }
  0xcb   :  { %v2480_v13 = vor.u32 %v3193_v10, %v2479_v8  ;;  %v2481_v16 = vld [vmem:[#allocation7 + $0x98] sm:$0xf0]  ;;  %v2407_v17 = vld [vmem:[#allocation7] sm:$0xf]  ;;  %v3214_v10 = vld [vmem:[#allocation8 + $0x44] sm:$0xf] }
  0xcc   :  { %vm405_vm1 = vcmp.gt.f32.partialorder %v401_v19, 0.0  ;;  %v407_v20 = vmul.f32 0.2, %v401_v19  ;;  %930 = vmatpush.bf16.msra.mxu1 %v2520_v14  ;;  %943 = vmatpush.bf16.msra.mxu2 %v2460_v15  ;;  %v2420_v14 = vor.u32 %v3176_v11, %v2417_v12  ;;  %v3192_v15 = vld [vmem:[#allocation7 + $0x94] sm:$0xf] }
  0xcd   :  { %956 = vmatpush.bf16.msra.mxu3 %v2524_v18  ;;  %v2484_v18 = vor.u32 %v3192_v15, %v2481_v16  ;;  %v2568_v8 = vld [vmem:[#allocation8 + $0x40] sm:$0xf]  ;;  %v2570_v12 = vld [vmem:[#allocation8 + $0x48] sm:$0xf0]  ;;  %v3213_v15 = vld [vmem:[#allocation8 + $0x34] sm:$0xf0] }
  0xce   :  { %v409_v21 = vsel %vm405_vm1, %v401_v19, %v407_v20  ;;  %v2447_v19 = vld [vmem:[#allocation7 + $0x50] sm:$0xf]  ;;  %v3185_v20 = vld [vmem:[#allocation7 + $0x54] sm:$0xf0]  ;;  %v3212_v16 = vld [vmem:[#allocation8 + $0x34] sm:$0xf] }
  0xcf   :  { %v389_v22 = vpop.f32.mrf.mxu2  ;;  %v411_v23 = vpack.c.bf16 %v409_v21, %v409_v21  ;;  %v2511_v21 = vld [vmem:[#allocation7 + $0xd0] sm:$0xf] }
  0xd0   :  { %v402_v24 = vpop.f32.mrf.mxu3  ;;  %v2448_v22 = vor.u32 %v3185_v20, %v2447_v19  ;;  %v3175_v19 = vld [vmem:[#allocation7 + $0x4] sm:$0xf0]  ;;  %v2471_v20 = vld [vmem:[#allocation7 + $0x80] sm:$0xf] }
  0xd1   :  { %631 = vmatmul.bf16.vlgmr.msrb.gmra.mxu1 %v411_v23  ;;  %657 = vmatmul.bf16.vlgmr.msrb.gmra.mxu3 %v411_v23  ;;  %v3201_v23 = vld [vmem:[#allocation7 + $0xd4] sm:$0xf0]  ;;  %v3184_v24 = vld [vmem:[#allocation7 + $0x54] sm:$0xf] }
  0xd2   :  { %v2512_v26 = vor.u32 %v3201_v23, %v2511_v21  ;;  %918 = vmatpush.bf16.msra.mxu0 %v2448_v22  ;;  %v3191_v21 = vld [vmem:[#allocation7 + $0x84] sm:$0xf0]  ;;  %v2408_v22 = vor.u32 %v3175_v19, %v2407_v17 }
  0xd3   :  { %v2472_v23 = vor.u32 %v3191_v21, %v2471_v20  ;;  %v2552_v20 = vld [vmem:[#allocation8 + $0x20] sm:$0xf]  ;;  %v3211_v21 = vld [vmem:[#allocation8 + $0x24] sm:$0xf0] }
  0xd4   :  { %931 = vmatpush.bf16.msra.mxu1 %v2512_v26  ;;  %v3190_v26 = vld [vmem:[#allocation7 + $0x84] sm:$0xf] }
 0x146   :  { %v619_v25 = vpop.f32.mrf.mxu0 }
 0x147   :  { %v620_v30 = vadd.f32 %v619_v25, %v446_v27  ;;  %v2449_v25 = vld [vmem:[#allocation7 + $0x58] sm:$0xf0] }
 0x148   :  { %v2452_v27 = vor.u32 %v3184_v24, %v2449_v25  ;;  %v3174_v24 = vld [vmem:[#allocation7 + $0x4] sm:$0xf]  ;;  %v2409_v25 = vld [vmem:[#allocation7 + $0x8] sm:$0xf0] }
 0x14a   :  { %944 = vmatpush.bf16.msra.mxu2 %v2452_v27  ;;  %v2412_v27 = vor.u32 %v3174_v24, %v2409_v25  ;;  %v2554_v24 = vld [vmem:[#allocation8 + $0x28] sm:$0xf0]  ;;  %v2544_v25 = vld [vmem:[#allocation8 + $0x10] sm:$0xf] }
 0x14c   :  { %v645_v28 = vpop.f32.mrf.mxu2 }
 0x14d   :  { %v646_v34 = vadd.f32 %v645_v28, %v447_v31  ;;  %v3200_v28 = vld [vmem:[#allocation7 + $0xd4] sm:$0xf]  ;;  %v2439_v31 = vld [vmem:[#allocation7 + $0x40] sm:$0xf] }
 0x14e   :  { %v632_v29 = vpop.f32.mrf.mxu1  ;;  %v621_v32 = vpop.f32.mrf.mxu0 }
 0x14f   :  { %v633_v33 = vadd.f32 %v632_v29, %v620_v30  ;;  %v2513_v29 = vld [vmem:[#allocation7 + $0xd8] sm:$0xf0]  ;;  %v3183_v32 = vld [vmem:[#allocation7 + $0x44] sm:$0xf0] }
 0x150   :  { %v2516_v30 = vor.u32 %v3200_v28, %v2513_v29  ;;  %v2473_v28 = vld [vmem:[#allocation7 + $0x88] sm:$0xf0] }
 0x151   :  { %v664_v36 = vmul.f32 0.2, %v633_v33  ;;  %vm662_vm2 = vcmp.gt.f32.partialorder %v633_v33, 0.0  ;;  %v2476_v29 = vor.u32 %v3190_v26, %v2473_v28  ;;  %v3209_v26 = vld [vmem:[#allocation8 + $0x14] sm:$0xf0] }
 0x152   :  { %957 = vmatpush.bf16.msra.mxu3 %v2516_v30  ;;  %v3208_v28 = vld [vmem:[#allocation8 + $0x14] sm:$0xf] }
 0x153   :  { %v666_v41 = vsel %vm662_vm2, %v633_v33, %v664_v36  ;;  %v2503_v33 = vld [vmem:[#allocation7 + $0xc0] sm:$0xf]  ;;  %v3182_v36 = vld [vmem:[#allocation7 + $0x44] sm:$0xf] }
 0x154   :  { %v658_v35 = vpop.f32.mrf.mxu3  ;;  %v647_v38 = vpop.f32.mrf.mxu2 }
 0x155   :  { %v659_v37 = vadd.f32 %v658_v35, %v646_v34  ;;  %v2440_v34 = vor.u32 %v3183_v32, %v2439_v31  ;;  %v3199_v35 = vld [vmem:[#allocation7 + $0xc4] sm:$0xf0]  ;;  %v2592_v31 = vld [vmem:[#allocation8 + $0x70] sm:$0xf]  ;;  %v3221_v32 = vld [vmem:[#allocation8 + $0x74] sm:$0xf0] }
 0x156   :  { %v634_v39 = vpop.f32.mrf.mxu1  ;;  %v2504_v38 = vor.u32 %v3199_v35, %v2503_v33  ;;  %v3220_v33 = vld [vmem:[#allocation8 + $0x74] sm:$0xf]  ;;  %v2593_v35 = vor.u32 %v3221_v32, %v2592_v31  ;;  %v2536_v32 = vld [vmem:[#allocation8] sm:$0xf] }
 0x157   :  { %v665_v40 = vmul.f32 0.2, %v659_v37  ;;  %vm663_vm3 = vcmp.gt.f32.partialorder %v659_v37, 0.0  ;;  %919 = vmatpush.bf16.msra.mxu0 %v2440_v34 }
 0x158   :  { %932 = vmatpush.bf16.msra.mxu1 %v2504_v38 }
 0x159   :  { %v667_v42 = vsel %vm663_vm3, %v659_v37, %v665_v40  ;;  %v2441_v37 = vld [vmem:[#allocation7 + $0x48] sm:$0xf0]  ;;  %v3198_v40 = vld [vmem:[#allocation7 + $0xc4] sm:$0xf] }
 0x15a   :  { %v668_v43 = vadd.f32 %v667_v42, %v666_v41  ;;  %v2444_v39 = vor.u32 %v3182_v36, %v2441_v37  ;;  %v2594_v36 = vld [vmem:[#allocation8 + $0x78] sm:$0xf0] }
 0x15b   :  { %v2597_v37 = vor.u32 %v3220_v33, %v2594_v36  ;;  %v3207_v33 = vld [vmem:[#allocation8 + $0x4] sm:$0xf0] }
 0x15c   :  { %v660_v44 = vpop.f32.mrf.mxu3  ;;  %669 = vadd.xlane.f32.xlu0 %v668_v43  ;;  %945 = vmatpush.bf16.msra.mxu2 %v2444_v39  ;;  %v2431_v43 = vld [vmem:[#allocation7 + $0x30] sm:$0xf]  ;;  %v2537_v36 = vor.u32 %v3207_v33, %v2536_v32  ;;  %v2648_v32 = vld [vmem:[#allocation10 + $0x60] sm:$0xf] }
 0x15d   :  { %v3181_v44 = vld [vmem:[#allocation7 + $0x34] sm:$0xf0]  ;;  %933 = vmatpush.bf16.msra.mxu1 %v2496_v50 }
 0x15e   :  { %v2432_v46 = vor.u32 %v3181_v44, %v2431_v43  ;;  %v700_v44 = vld [vmem:[%s3765_s6] sm:$0x3] }
 0x15f   :  { %v703_v47 = vperm.slane %v700_v44, 1 }
 0x160   :  { %920 = vmatpush.bf16.msra.mxu0 %v2432_v46  ;;  %946 = vmatpush.bf16.msra.mxu2 %v2436_v51  ;;  %v702_v46 = vperm.slane %v700_v44, 0 }
 0x161   :  { %934 = vmatpush.bf16.msra.mxu1 %v2488_v62 }
 0x164   :  { %921 = vmatpush.bf16.msra.mxu0 %v2424_v58 }
 0x165   :  { %935 = vmatpush.bf16.msra.mxu1 %v2480_v13  ;;  %v2573_v13 = vor.u32 %v3214_v10, %v2570_v12  ;;  %v3274_v12 = vld [vmem:[#allocation10 + $0x1a4] sm:$0xf] }
 0x169   :  { %936 = vmatpush.bf16.msra.mxu1 %v2472_v23  ;;  %v2553_v23 = vor.u32 %v3211_v21, %v2552_v20  ;;  %v2792_v20 = vld [vmem:[#allocation10 + $0x180] sm:$0xf] }
 0x16d   :  { %1092 = vmatpush.bf16.msrb.mxu1 %v2597_v37 }
 0x1cf   :  { %v670_v0 = vpop.xlane.xlu0 %669 }
 0x1d0   :  { %v678_v1 = vmul.f32 %v3693_v63, %v670_v0  ;;  %v2428_v0 = vor.u32 %v3178_v60, %v2425_v61  ;;  %v3219_v60 = vld [vmem:[#allocation8 + $0x64] sm:$0xf0]  ;;  %v3218_v61 = vld [vmem:[#allocation8 + $0x64] sm:$0xf] }
 0x1d1   :  { %v2585_v62 = vor.u32 %v3219_v60, %v2584_v59 }
 0x1d2   :  { %v3696_v2 = vsub.f32 %v666_v41, %v678_v1  ;;  %v3698_v3 = vsub.f32 %v667_v42, %v678_v1  ;;  %v2505_v41 = vld [vmem:[#allocation7 + $0xc8] sm:$0xf0]  ;;  %v3194_v1 = vld [vmem:[#allocation7 + $0xa4] sm:$0xf]  ;;  %947 = vmatpush.bf16.msra.mxu2 %v2428_v0 }
 0x1d3   :  { %v2508_v42 = vor.u32 %v3198_v40, %v2505_v41  ;;  %v2586_v0 = vld [vmem:[#allocation8 + $0x68] sm:$0xf0] }
 0x1d4   :  { %v681_v4 = vmul.f32 %v3696_v2, %v3696_v2  ;;  %v682_v5 = vmul.f32 %v3698_v3, %v3698_v3 }
 0x1d5   :  { %958 = vmatpush.bf16.msra.mxu3 %v2508_v42 }
 0x1d6   :  { %v683_v6 = vadd.f32 %v682_v5, %v681_v4  ;;  %v2489_v4 = vld [vmem:[#allocation7 + $0xa8] sm:$0xf0]  ;;  %948 = vmatpush.bf16.msra.mxu2 %v2420_v14  ;;  %v2560_v14 = vld [vmem:[#allocation8 + $0x30] sm:$0xf] }
 0x1d7   :  { %v2492_v5 = vor.u32 %v3194_v1, %v2489_v4  ;;  %v3217_v1 = vld [vmem:[#allocation8 + $0x54] sm:$0xf0]  ;;  %v2561_v17 = vor.u32 %v3213_v15, %v2560_v14 }
 0x1d8   :  { %684 = vadd.xlane.f32.xlu0 %v683_v6  ;;  %v2415_v6 = vld [vmem:[#allocation7 + $0x10] sm:$0xf] }
 0x1d9   :  { %959 = vmatpush.bf16.msra.mxu3 %v2500_v54  ;;  %v2416_v9 = vor.u32 %v3177_v7, %v2415_v6  ;;  %v2578_v6 = vld [vmem:[#allocation8 + $0x58] sm:$0xf0] }
 0x1da   :  { %949 = vmatpush.bf16.msra.mxu2 %v2412_v27 }
 0x1db   :  { %922 = vmatpush.bf16.msra.mxu0 %v2416_v9  ;;  %v3215_v9 = vld [vmem:[#allocation8 + $0x44] sm:$0xf0] }
 0x1dc   :  { %v2569_v11 = vor.u32 %v3215_v9, %v2568_v8  ;;  %v3276_v8 = vld [vmem:[#allocation10 + $0x1ac] sm:$0xf0]  ;;  %v3242_v9 = vld [vmem:[#allocation10 + $0xa4] sm:$0xf] }
 0x1dd   :  { %960 = vmatpush.bf16.msra.mxu3 %v2492_v5  ;;  %v3216_v5 = vld [vmem:[#allocation8 + $0x54] sm:$0xf] }
 0x1de   :  { %v2581_v7 = vor.u32 %v3216_v5, %v2578_v6  ;;  %v3244_v5 = vld [vmem:[#allocation10 + $0xac] sm:$0xf0] }
 0x1df   :  { %923 = vmatpush.bf16.msra.mxu0 %v2408_v22  ;;  %v3210_v22 = vld [vmem:[#allocation8 + $0x24] sm:$0xf] }
 0x1e0   :  { %v2557_v27 = vor.u32 %v3210_v22, %v2554_v24 }
 0x1e1   :  { %961 = vmatpush.bf16.msra.mxu3 %v2484_v18  ;;  %v2562_v18 = vld [vmem:[#allocation8 + $0x38] sm:$0xf0] }
 0x1e2   :  { %v2565_v19 = vor.u32 %v3212_v16, %v2562_v18  ;;  %v2664_v18 = vld [vmem:[#allocation10 + $0x80] sm:$0xf] }
 0x1e3   :  { %1079 = vmatpush.bf16.msrb.mxu0 %v2593_v35  ;;  %v2538_v35 = vld [vmem:[#allocation8 + $0x8] sm:$0xf0] }
 0x1e5   :  { %962 = vmatpush.bf16.msra.mxu3 %v2476_v29  ;;  %v2546_v29 = vld [vmem:[#allocation8 + $0x18] sm:$0xf0] }
 0x1e6   :  { %v2549_v31 = vor.u32 %v3208_v28, %v2546_v29  ;;  %v3270_v28 = vld [vmem:[#allocation10 + $0x184] sm:$0xf]  ;;  %v2794_v29 = vld [vmem:[#allocation10 + $0x190] sm:$0xf0] }
 0x1e7   :  { %1080 = vmatpush.bf16.msrb.mxu0 %v2585_v62  ;;  %v3246_v62 = vld [vmem:[#allocation10 + $0xc4] sm:$0xf] }
 0x24b   :  { %v685_v30 = vpop.xlane.xlu0 %684 }
 0x24c   :  { %v686_v34 = vmul.f32 %v685_v30, %v3693_v63  ;;  %v708_v63 = vld [vmem:[%s3766_s7] sm:$0x3]  ;;  %v2545_v30 = vor.u32 %v3209_v26, %v2544_v25  ;;  %v3272_v25 = vld [vmem:[#allocation10 + $0x18c] sm:$0xf0]  ;;  %v3238_v26 = vld [vmem:[#allocation10 + $0x84] sm:$0xf] }
 0x24d   :  { %v710_v51 = vperm.slane %v708_v63, 0  ;;  %v711_v52 = vperm.slane %v708_v63, 1  ;;  %v2793_v33 = vor.u32 %v3272_v25, %v2792_v20  ;;  %v2720_v25 = vld [vmem:[#allocation10 + $0xe8] sm:$0xf] }
 0x24e   :  { %v687_v38 = vadd.f32 1e-05, %v686_v34  ;;  %v3206_v34 = vld [vmem:[#allocation8 + $0x4] sm:$0xf] }
 0x24f   :  { %v2541_v37 = vor.u32 %v3206_v34, %v2538_v35  ;;  %v3236_v35 = vld [vmem:[#allocation10 + $0x6c] sm:$0xf0] }
 0x250   :  { %3364 = vrsqrt.f32 %v687_v38  ;;  %vm694_vm6 = vweird.f32 %v687_v38 }
 0x256   :  { %v3365_v39 = vpop.eup %3364 }
 0x257   :  { %v689_v40 = vmul.f32 %v3365_v39, %v687_v38  ;;  %vm695_vm5 = vweird.f32 %v3365_v39  ;;  %v750_v38 = vld [vmem:[%s3768_s9] sm:$0x3] }
 0x258   :  { %vm696_vm7 = vmor %vm694_vm6, %vm695_vm5 }
 0x259   :  { %v690_v41 = vmul.f32 %v3365_v39, %v689_v40  ;;  %v753_v40 = vperm.slane %v750_v38, 1 }
 0x25b   :  { %v691_v42 = vmul.f32 0.5, %v690_v41  ;;  %v2712_v41 = vld [vmem:[#allocation10 + $0xe0] sm:$0xf] }
 0x25d   :  { %v692_v43 = vsub.f32 1.5, %v691_v42  ;;  %v3252_v42 = vld [vmem:[#allocation10 + $0xec] sm:$0xf0] }
 0x25e   :  { %v2713_v63 = vor.u32 %v3252_v42, %v2712_v41  ;;  %v2650_v41 = vld [vmem:[#allocation10 + $0x70] sm:$0xf0]  ;;  %v3266_v42 = vld [vmem:[#allocation10 + $0x164] sm:$0xf] }
 0x25f   :  { %v693_v45 = vmul.f32 %v3365_v39, %v692_v43  ;;  %v2840_v43 = vld [vmem:[#allocation10 + $0x1e0] sm:$0xf] }
 0x260   :  { %1507 = vmatpush.bf16.msrb.mxu2 %v2713_v63  ;;  %v2632_v63 = vld [vmem:[#allocation10 + $0x40] sm:$0xf] }
 0x261   :  { %v697_v48 = vsel %vm696_vm7, %v3365_v39, %v693_v45  ;;  %v752_v39 = vperm.slane %v750_v38, 0 }
 0x262   :  { %v698_v49 = vmul.f32 %v697_v48, %v3696_v2  ;;  %v699_v50 = vmul.f32 %v697_v48, %v3698_v3  ;;  %v2589_v2 = vor.u32 %v3218_v61, %v2586_v0  ;;  %v2576_v3 = vld [vmem:[#allocation8 + $0x50] sm:$0xf]  ;;  %v2714_v48 = vld [vmem:[#allocation10 + $0xf0] sm:$0xf0] }
 0x263   :  { %v2577_v4 = vor.u32 %v3217_v1, %v2576_v3  ;;  %v2698_v0 = vld [vmem:[#allocation10 + $0xd0] sm:$0xf0] }
 0x264   :  { %v706_v53 = vmul.f32 %v702_v46, %v698_v49  ;;  %v707_v54 = vmul.f32 %v703_v47, %v699_v50  ;;  %1093 = vmatpush.bf16.msrb.mxu1 %v2589_v2  ;;  %v3284_v46 = vld [vmem:[#allocation10 + $0x1ec] sm:$0xf0]  ;;  %v3250_v47 = vld [vmem:[#allocation10 + $0xe4] sm:$0xf]  ;;  %v2701_v3 = vor.u32 %v3246_v62, %v2698_v0  ;;  %v2826_v1 = vld [vmem:[#allocation10 + $0x1d0] sm:$0xf0] }
 0x265   :  { %1081 = vmatpush.bf16.msrb.mxu0 %v2577_v4  ;;  %v2841_v50 = vor.u32 %v3284_v46, %v2840_v43  ;;  %v3278_v2 = vld [vmem:[#allocation10 + $0x1c4] sm:$0xf]  ;;  %v2680_v4 = vld [vmem:[#allocation10 + $0xa0] sm:$0xf]  ;;  %v2778_v43 = vld [vmem:[#allocation10 + $0x170] sm:$0xf0] }
 0x266   :  { %v714_v55 = vadd.f32 %v710_v51, %v706_v53  ;;  %v715_v56 = vadd.f32 %v711_v52, %v707_v54  ;;  %v2717_v51 = vor.u32 %v3250_v47, %v2714_v48  ;;  %v3282_v52 = vld [vmem:[#allocation10 + $0x1e4] sm:$0xf]  ;;  %v2842_v53 = vld [vmem:[#allocation10 + $0x1f0] sm:$0xf0]  ;;  %v2696_v54 = vld [vmem:[#allocation10 + $0xc0] sm:$0xf]  ;;  %v2829_v6 = vor.u32 %v3278_v2, %v2826_v1 }
 0x267   :  { %1520 = vmatpush.bf16.msrb.mxu3 %v2841_v50  ;;  %v2681_v10 = vor.u32 %v3244_v5, %v2680_v4  ;;  %v3232_v50 = vld [vmem:[#allocation10 + $0x4c] sm:$0xf0]  ;;  %v2616_v0 = vld [vmem:[#allocation10 + $0x20] sm:$0xf]  ;;  %v3226_v5 = vld [vmem:[#allocation10 + $0x24] sm:$0xf] }
 0x268   :  { %v716_v57 = vpack.c.bf16 %v714_v55, %v714_v55  ;;  %v717_v58 = vpack.c.bf16 %v715_v56, %v715_v56  ;;  %1094 = vmatpush.bf16.msrb.mxu1 %v2581_v7  ;;  %v2845_v55 = vor.u32 %v3282_v52, %v2842_v53  ;;  %v3248_v56 = vld [vmem:[#allocation10 + $0xcc] sm:$0xf0]  ;;  %v2808_v7 = vld [vmem:[#allocation10 + $0x1a0] sm:$0xf] }
 0x269   :  { %1082 = vmatpush.bf16.msrb.mxu0 %v2569_v11  ;;  %v2697_v60 = vor.u32 %v3248_v56, %v2696_v54  ;;  %v2682_v11 = vld [vmem:[#allocation10 + $0xb0] sm:$0xf0]  ;;  %v2809_v16 = vor.u32 %v3276_v8, %v2808_v7  ;;  %v3264_v52 = vld [vmem:[#allocation10 + $0x14c] sm:$0xf0]  ;;  %v2781_v54 = vor.u32 %v3266_v42, %v2778_v43  ;;  %v3258_v7 = vld [vmem:[#allocation10 + $0x124] sm:$0xf] }
 0x26a   :  { %924 = vmatmul.bf16.vlgmr.msra.gmra.mxu0 %v716_v57  ;;  %937 = vmatmul.bf16.vlgmr.msra.gmra.mxu1 %v717_v58  ;;  %v2634_v56 = vld [vmem:[#allocation10 + $0x50] sm:$0xf0]  ;;  %v3228_v2 = vld [vmem:[#allocation10 + $0x2c] sm:$0xf0]  ;;  %v3249_v42 = vld [vmem:[#allocation10 + $0xd4] sm:$0xf0] }
 0x26b   :  { %950 = vmatmul.bf16.vlgmr.msra.gmra.mxu2 %v716_v57  ;;  %963 = vmatmul.bf16.vlgmr.msra.gmra.mxu3 %v717_v58  ;;  %v2824_v57 = vld [vmem:[#allocation10 + $0x1c0] sm:$0xf]  ;;  %v3280_v58 = vld [vmem:[#allocation10 + $0x1cc] sm:$0xf0]  ;;  %v2746_v8 = vld [vmem:[#allocation10 + $0x130] sm:$0xf0] }
 0x26c   :  { %1095 = vmatpush.bf16.msrb.mxu1 %v2573_v13  ;;  %v2825_v61 = vor.u32 %v3280_v58, %v2824_v57  ;;  %1508 = vmatpush.bf16.msrb.mxu2 %v2697_v60  ;;  %v2810_v13 = vld [vmem:[#allocation10 + $0x1b0] sm:$0xf0]  ;;  %v3262_v57 = vld [vmem:[#allocation10 + $0x144] sm:$0xf]  ;;  %v2633_v60 = vor.u32 %v3232_v50, %v2632_v63  ;;  %v3260_v4 = vld [vmem:[#allocation10 + $0x12c] sm:$0xf0] }
 0x26d   :  { %1083 = vmatpush.bf16.msrb.mxu0 %v2561_v17  ;;  %v2685_v17 = vor.u32 %v3242_v9, %v2682_v11  ;;  %v2813_v24 = vor.u32 %v3274_v12, %v2810_v13  ;;  %v2762_v58 = vld [vmem:[#allocation10 + $0x150] sm:$0xf0]  ;;  %v973_v9 = vld [vmem:[%s3781_s20] sm:$0xff]  ;;  %v2832_v43 = vld [vmem:[#allocation10 + $0x1c8] sm:$0xf] }
 0x26e   :  { %1521 = vmatpush.bf16.msrb.mxu3 %v2825_v61  ;;  %v2765_v1 = vor.u32 %v3262_v57, %v2762_v58  ;;  %v2600_v13 = vld [vmem:[#allocation10] sm:$0xf]  ;;  %v2706_v63 = vld [vmem:[#allocation10 + $0xd8] sm:$0xf0]  ;;  %v3243_v57 = vld [vmem:[#allocation10 + $0xac] sm:$0xf] }
 0x270   :  { %1096 = vmatpush.bf16.msrb.mxu1 %v2565_v19  ;;  %v3240_v19 = vld [vmem:[#allocation10 + $0x8c] sm:$0xf0]  ;;  %1509 = vmatpush.bf16.msrb.mxu2 %v2681_v10  ;;  %v2617_v10 = vor.u32 %v3228_v2, %v2616_v0 }
 0x271   :  { %1084 = vmatpush.bf16.msrb.mxu0 %v2553_v23 }
 0x272   :  { %1522 = vmatpush.bf16.msrb.mxu3 %v2809_v16  ;;  %v2749_v16 = vor.u32 %v3258_v7, %v2746_v8  ;;  %v3239_v7 = vld [vmem:[#allocation10 + $0x8c] sm:$0xf]  ;;  %v2674_v8 = vld [vmem:[#allocation10 + $0x98] sm:$0xf0] }
 0x274   :  { %1097 = vmatpush.bf16.msrb.mxu1 %v2557_v27  ;;  %v2666_v27 = vld [vmem:[#allocation10 + $0x90] sm:$0xf0] }
 0x275   :  { %1085 = vmatpush.bf16.msrb.mxu0 %v2545_v30  ;;  %v2669_v34 = vor.u32 %v3238_v26, %v2666_v27  ;;  %v3253_v26 = vld [vmem:[#allocation10 + $0xf4] sm:$0xf0]  ;;  %v2848_v27 = vld [vmem:[#allocation10 + $0x1e8] sm:$0xf] }
 0x276   :  { %1523 = vmatpush.bf16.msrb.mxu3 %v2793_v33 }
 0x278   :  { %1098 = vmatpush.bf16.msrb.mxu1 %v2549_v31  ;;  %v2665_v31 = vor.u32 %v3240_v19, %v2664_v18  ;;  %v3256_v18 = vld [vmem:[#allocation10 + $0x10c] sm:$0xf0]  ;;  %v3222_v19 = vld [vmem:[#allocation10 + $0x4] sm:$0xf] }
 0x279   :  { %1086 = vmatpush.bf16.msrb.mxu0 %v2537_v36  ;;  %v2776_v36 = vld [vmem:[#allocation10 + $0x160] sm:$0xf] }
 0x27a   :  { %1510 = vmatpush.bf16.msrb.mxu2 %v2665_v31  ;;  %v2722_v31 = vld [vmem:[#allocation10 + $0xf8] sm:$0xf0] }
 0x27c   :  { %1099 = vmatpush.bf16.msrb.mxu1 %v2541_v37  ;;  %v3268_v37 = vld [vmem:[#allocation10 + $0x16c] sm:$0xf0] }
 0x27d   :  { %1533 = vmatpush.bf16.msra.mxu0 %v2717_v51  ;;  %v2777_v48 = vor.u32 %v3268_v37, %v2776_v36  ;;  %v2760_v51 = vld [vmem:[#allocation10 + $0x140] sm:$0xf] }
 0x27e   :  { %v2761_v61 = vor.u32 %v3264_v52, %v2760_v51  ;;  %v2688_v52 = vld [vmem:[#allocation10 + $0xa8] sm:$0xf] }
 0x27f   :  { %1524 = vmatpush.bf16.msrb.mxu3 %v2777_v48 }
 0x280   :  { %1546 = vmatpush.bf16.msra.mxu1 %v2845_v55  ;;  %v3230_v55 = vld [vmem:[#allocation10 + $0x44] sm:$0xf] }
 0x281   :  { %1534 = vmatpush.bf16.msra.mxu0 %v2701_v3  ;;  %v2637_v62 = vor.u32 %v3230_v55, %v2634_v56  ;;  %v2744_v3 = vld [vmem:[#allocation10 + $0x120] sm:$0xf]  ;;  %v3277_v56 = vld [vmem:[#allocation10 + $0x1b4] sm:$0xf0] }
 0x282   :  { %v2745_v11 = vor.u32 %v3260_v4, %v2744_v3  ;;  %v2672_v3 = vld [vmem:[#allocation10 + $0x88] sm:$0xf] }
 0x283   :  { %1525 = vmatpush.bf16.msrb.mxu3 %v2761_v61  ;;  %v3275_v61 = vld [vmem:[#allocation10 + $0x1ac] sm:$0xf]  ;;  %v2800_v4 = vld [vmem:[#allocation10 + $0x188] sm:$0xf] }
 0x284   :  { %1547 = vmatpush.bf16.msra.mxu1 %v2829_v6  ;;  %v2618_v6 = vld [vmem:[#allocation10 + $0x30] sm:$0xf0] }
 0x285   :  { %1535 = vmatpush.bf16.msra.mxu0 %v2685_v17  ;;  %v2621_v12 = vor.u32 %v3226_v5, %v2618_v6  ;;  %v2728_v17 = vld [vmem:[#allocation10 + $0x100] sm:$0xf]  ;;  %v3273_v6 = vld [vmem:[#allocation10 + $0x194] sm:$0xf0] }
 0x287   :  { %1526 = vmatpush.bf16.msrb.mxu3 %v2745_v11  ;;  %v3271_v11 = vld [vmem:[#allocation10 + $0x18c] sm:$0xf] }
 0x288   :  { %1548 = vmatpush.bf16.msra.mxu1 %v2813_v24 }
 0x289   :  { %1536 = vmatpush.bf16.msra.mxu0 %v2669_v34  ;;  %v3283_v34 = vld [vmem:[#allocation10 + $0x1ec] sm:$0xf] }
 0x2e7   :  { %v925_v44 = vpop.f32.mrf.mxu0  ;;  %v938_v45 = vpop.f32.mrf.mxu1 }
 0x2e8   :  { %v926_v49 = vadd.f32 %v925_v44, %v752_v39  ;;  %v2797_v39 = vor.u32 %v3270_v28, %v2794_v29  ;;  %v3285_v29 = vld [vmem:[#allocation10 + $0x1f4] sm:$0xf0] }
 0x2ea   :  { %v3716_v59 = vadd.f32 %v938_v45, %v926_v49  ;;  %v2649_v45 = vor.u32 %v3236_v35, %v2648_v32  ;;  %1549 = vmatpush.bf16.msra.mxu1 %v2797_v39  ;;  %v2729_v32 = vor.u32 %v3256_v18, %v2728_v17  ;;  %v2850_v35 = vld [vmem:[#allocation10 + $0x1f8] sm:$0xf0]  ;;  %v2849_v39 = vor.u32 %v3285_v29, %v2848_v27  ;;  %v3269_v18 = vld [vmem:[#allocation10 + $0x174] sm:$0xf0] }
 0x2eb   :  { %v3233_v27 = vld [vmem:[#allocation10 + $0x54] sm:$0xf0] }
 0x2ec   :  { %2123 = vst [vmem:[%s3776_s17] sm:$0xff] %v3716_v59  ;;  %1511 = vmatpush.bf16.msrb.mxu2 %v2649_v45  ;;  %v3247_v45 = vld [vmem:[#allocation10 + $0xcc] sm:$0xf]  ;;  %1527 = vmatpush.bf16.msrb.mxu3 %v2729_v32  ;;  %v3265_v29 = vld [vmem:[#allocation10 + $0x154] sm:$0xf0] }
 0x2ed   :  { %v2709_v50 = vor.u32 %v3247_v45, %v2706_v63  ;;  %v3231_v32 = vld [vmem:[#allocation10 + $0x4c] sm:$0xf]  ;;  %v2754_v45 = vld [vmem:[#allocation10 + $0x138] sm:$0xf0] }
 0x2ee   :  { %v951_v14 = vpop.f32.mrf.mxu2  ;;  %v964_v15 = vpop.f32.mrf.mxu3  ;;  %1550 = vmatpush.bf16.msra.mxu1 %v2781_v54  ;;  %v2816_v54 = vld [vmem:[#allocation10 + $0x1a8] sm:$0xf] }
 0x2ef   :  { %v952_v21 = vadd.f32 %v951_v14, %v753_v40  ;;  %v927_v22 = vpop.f32.mrf.mxu0  ;;  %v940_v23 = vpop.f32.mrf.mxu1  ;;  %v3234_v40 = vld [vmem:[#allocation10 + $0x64] sm:$0xf]  ;;  %v3224_v14 = vld [vmem:[#allocation10 + $0xc] sm:$0xf0]  ;;  %v2817_v58 = vor.u32 %v3277_v56, %v2816_v54  ;;  %v3255_v54 = vld [vmem:[#allocation10 + $0x10c] sm:$0xf] }
 0x2f0   :  { %v2653_v49 = vor.u32 %v3234_v40, %v2650_v41  ;;  %1512 = vmatpush.bf16.msrb.mxu2 %v2633_v60  ;;  %v3254_v22 = vld [vmem:[#allocation10 + $0x104] sm:$0xf]  ;;  %v2730_v23 = vld [vmem:[#allocation10 + $0x110] sm:$0xf0]  ;;  %v2601_v24 = vor.u32 %v3224_v14, %v2600_v13  ;;  %v2704_v41 = vld [vmem:[#allocation10 + $0xc8] sm:$0xf]  ;;  %1572 = vmatpush.bf16.msra.mxu3 %v2849_v39 }
 0x2f1   :  { %v965_v30 = vadd.f32 %v964_v15, %v952_v21  ;;  %v2602_v21 = vld [vmem:[#allocation10 + $0x10] sm:$0xf0]  ;;  %v2733_v37 = vor.u32 %v3254_v22, %v2730_v23  ;;  %v2705_v48 = vor.u32 %v3249_v42, %v2704_v41  ;;  %v2690_v60 = vld [vmem:[#allocation10 + $0xb8] sm:$0xf0]  ;;  %v2656_v14 = vld [vmem:[#allocation10 + $0x68] sm:$0xf] }
 0x2f2   :  { %1537 = vmatpush.bf16.msra.mxu0 %v2653_v49  ;;  %1551 = vmatpush.bf16.msra.mxu1 %v2765_v1  ;;  %v2605_v33 = vor.u32 %v3222_v19, %v2602_v21  ;;  %v2693_v0 = vor.u32 %v3243_v57, %v2690_v60  ;;  %v3241_v1 = vld [vmem:[#allocation10 + $0x94] sm:$0xf0]  ;;  %v3235_v19 = vld [vmem:[#allocation10 + $0x6c] sm:$0xf] }
 0x2f3   :  { %v2533_v38 = vclamps-f32 %v965_v30, 15.0  ;;  %v3251_v30 = vld [vmem:[#allocation10 + $0xec] sm:$0xf]  ;;  %v2673_v5 = vor.u32 %v3241_v1, %v2672_v3  ;;  %v3261_v41 = vld [vmem:[#allocation10 + $0x134] sm:$0xf0] }
 0x2f4   :  { %1513 = vmatpush.bf16.msrb.mxu2 %v2617_v10  ;;  %v2725_v40 = vor.u32 %v3251_v30, %v2722_v31  ;;  %v2677_v10 = vor.u32 %v3239_v7, %v2674_v8  ;;  %v3267_v23 = vld [vmem:[#allocation10 + $0x16c] sm:$0xf]  ;;  %v2912_v7 = vld [vmem:[#allocation11 + $0x70] sm:$0xf]  ;;  %v3301_v8 = vld [vmem:[#allocation11 + $0x74] sm:$0xf0] }
 0x2f5   :  { %v970_v44 = vmul.f32 0.5, %v2533_v38  ;;  %2124 = vst [vmem:[%s3776_s17 + $0x8] sm:$0xff] %v2533_v38  ;;  %v2721_v38 = vor.u32 %v3253_v26, %v2720_v25  ;;  %v2640_v25 = vld [vmem:[#allocation10 + $0x48] sm:$0xf]  ;;  %v3227_v42 = vld [vmem:[#allocation10 + $0x2c] sm:$0xf] }
 0x2f6   :  { %v953_v46 = vpop.f32.mrf.mxu2  ;;  %v966_v47 = vpop.f32.mrf.mxu3  ;;  %1538 = vmatpush.bf16.msra.mxu0 %v2637_v62  ;;  %1552 = vmatpush.bf16.msra.mxu1 %v2749_v16  ;;  %v2818_v62 = vld [vmem:[#allocation10 + $0x1b8] sm:$0xf0]  ;;  %v2784_v16 = vld [vmem:[#allocation10 + $0x168] sm:$0xf]  ;;  %v2641_v30 = vor.u32 %v3233_v27, %v2640_v25 }
 0x2f7   :  { %v971_v53 = vmul.f32 1.442695, %v970_v44  ;;  %v3281_v44 = vld [vmem:[#allocation10 + $0x1d4] sm:$0xf0]  ;;  %v3279_v46 = vld [vmem:[#allocation10 + $0x1cc] sm:$0xf]  ;;  %v2821_v2 = vor.u32 %v3275_v61, %v2818_v62  ;;  %v2785_v21 = vor.u32 %v3269_v18, %v2784_v16 }
 0x2f8   :  { %1514 = vmatpush.bf16.msrb.mxu2 %v2601_v24  ;;  %v2834_v47 = vld [vmem:[#allocation10 + $0x1d8] sm:$0xf0]  ;;  %v2833_v49 = vor.u32 %v3281_v44, %v2832_v43  ;;  %v3259_v44 = vld [vmem:[#allocation10 + $0x12c] sm:$0xf]  ;;  %v993_v61 = vld [vmem:[%s3770_s11] sm:$0x3] }
 0x2f9   :  { %3366 = vpow2.f32 %v971_v53  ;;  %v2837_v51 = vor.u32 %v3279_v46, %v2834_v47  ;;  %v3245_v53 = vld [vmem:[#allocation10 + $0xb4] sm:$0xf0]  ;;  %v2786_v24 = vld [vmem:[#allocation10 + $0x178] sm:$0xf0]  ;;  %v2608_v47 = vld [vmem:[#allocation10 + $0x8] sm:$0xf] }
 0x2fa   :  { %1539 = vmatpush.bf16.msra.mxu0 %v2621_v12  ;;  %1553 = vmatpush.bf16.msra.mxu1 %v2733_v37  ;;  %v2689_v55 = vor.u32 %v3245_v53, %v2688_v52  ;;  %v2802_v12 = vld [vmem:[#allocation10 + $0x198] sm:$0xf0]  ;;  %v2789_v26 = vor.u32 %v3267_v23, %v2786_v24  ;;  %v2624_v37 = vld [vmem:[#allocation10 + $0x28] sm:$0xf]  ;;  %v3223_v52 = vld [vmem:[#allocation10 + $0xc] sm:$0xf] }
 0x2fb   :  { %1573 = vmatpush.bf16.msra.mxu3 %v2833_v49  ;;  %v2805_v13 = vor.u32 %v3271_v11, %v2802_v12  ;;  %v2736_v49 = vld [vmem:[#allocation10 + $0x108] sm:$0xf]  ;;  %v2610_v53 = vld [vmem:[#allocation10 + $0x18] sm:$0xf0]  ;;  %v995_v62 = vperm.slane %v993_v61, 0 }
 0x2fc   :  { %1559 = vmatpush.bf16.msra.mxu2 %v2721_v38  ;;  %v3229_v38 = vld [vmem:[#allocation10 + $0x34] sm:$0xf0]  ;;  %v2904_v23 = vld [vmem:[#allocation11 + $0x60] sm:$0xf]  ;;  %v3299_v24 = vld [vmem:[#allocation11 + $0x64] sm:$0xf0] }
 0x2fd   :  { %v2625_v43 = vor.u32 %v3229_v38, %v2624_v37  ;;  %v3349_v12 = vld [vmem:[#allocation11 + $0x1f4] sm:$0xf0]  ;;  %v2896_v37 = vld [vmem:[#allocation11 + $0x50] sm:$0xf] }
 0x2fe   :  { %1540 = vmatpush.bf16.msra.mxu0 %v2605_v33  ;;  %v2642_v33 = vld [vmem:[#allocation10 + $0x58] sm:$0xf0]  ;;  %v3297_v38 = vld [vmem:[#allocation11 + $0x54] sm:$0xf0] }
 0x2ff   :  { %v3367_v15 = vpop.eup %3366  ;;  %1574 = vmatpush.bf16.msra.mxu3 %v2817_v58  ;;  %v2613_v58 = vor.u32 %v3223_v52, %v2610_v53  ;;  %v3343_v52 = vld [vmem:[#allocation11 + $0x1c4] sm:$0xf0] }
 0x300   :  { %v974_v20 = vmul.f32 %v3367_v15, %v973_v9  ;;  %1560 = vmatpush.bf16.msra.mxu2 %v2705_v48  ;;  %v2801_v9 = vor.u32 %v3273_v6, %v2800_v4  ;;  %v3237_v15 = vld [vmem:[#allocation10 + $0x74] sm:$0xf0] }
 0x301   :  { %v2657_v17 = vor.u32 %v3237_v15, %v2656_v14  ;;  %v3225_v48 = vld [vmem:[#allocation10 + $0x14] sm:$0xf0] }
 0x302   :  { %v975_v28 = vadd.f32 %v974_v20, %v3716_v59  ;;  %v2853_v59 = vor.u32 %v3283_v34, %v2850_v35  ;;  %v2658_v20 = vld [vmem:[#allocation10 + $0x78] sm:$0xf0]  ;;  %v3263_v34 = vld [vmem:[#allocation10 + $0x14c] sm:$0xf]  ;;  %v2645_v35 = vor.u32 %v3231_v32, %v2642_v33  ;;  %v2609_v56 = vor.u32 %v3225_v48, %v2608_v47  ;;  %v3317_v6 = vld [vmem:[#allocation11 + $0xf4] sm:$0xf0] }
 0x303   :  { %1575 = vmatpush.bf16.msra.mxu3 %v2801_v9  ;;  %v2661_v22 = vor.u32 %v3235_v19, %v2658_v20  ;;  %v3104_v9 = vld [vmem:[#allocation11 + $0x1f0] sm:$0xf]  ;;  %v3333_v14 = vld [vmem:[#allocation11 + $0x174] sm:$0xf0]  ;;  %v2968_v20 = vld [vmem:[#allocation11 + $0xe0] sm:$0xf] }
 0x304   :  { %v976_v36 = vpack.c.bf16 %v975_v28, %v975_v28  ;;  %1561 = vmatpush.bf16.msra.mxu2 %v2689_v55  ;;  %v2768_v28 = vld [vmem:[#allocation10 + $0x148] sm:$0xf]  ;;  %v2738_v55 = vld [vmem:[#allocation10 + $0x118] sm:$0xf0]  ;;  %v3105_v25 = vor.u32 %v3349_v12, %v3104_v9  ;;  %v2888_v47 = vld [vmem:[#allocation11 + $0x40] sm:$0xf] }
 0x305   :  { %v2769_v31 = vor.u32 %v3265_v29, %v2768_v28  ;;  %v2741_v60 = vor.u32 %v3255_v54, %v2738_v55  ;;  %v3331_v32 = vld [vmem:[#allocation11 + $0x164] sm:$0xf0]  ;;  %v2944_v54 = vld [vmem:[#allocation11 + $0xb0] sm:$0xf]  ;;  %v3289_v12 = vld [vmem:[#allocation11 + $0x14] sm:$0xf0] }
 0x306   :  { %1087 = vmatmul.bf16.vlgmr.msrb.gmra.mxu0 %v976_v36  ;;  %1100 = vmatmul.bf16.vlgmr.msrb.gmra.mxu1 %v976_v36  ;;  %v2770_v36 = vld [vmem:[#allocation10 + $0x158] sm:$0xf0]  ;;  %v3295_v48 = vld [vmem:[#allocation11 + $0x44] sm:$0xf0] }
 0x307   :  { %1585 = vmatpush.bf16.msrb.mxu0 %v2725_v40  ;;  %1598 = vmatpush.bf16.msrb.mxu1 %v2853_v59  ;;  %v2773_v39 = vor.u32 %v3263_v34, %v2770_v36  ;;  %v2752_v40 = vld [vmem:[#allocation10 + $0x128] sm:$0xf]  ;;  %v2626_v59 = vld [vmem:[#allocation10 + $0x38] sm:$0xf0]  ;;  %v2960_v34 = vld [vmem:[#allocation11 + $0xd0] sm:$0xf]  ;;  %v2905_v36 = vor.u32 %v3299_v24, %v2904_v23  ;;  %v2889_v55 = vor.u32 %v3295_v48, %v2888_v47 }
 0x308   :  { %1562 = vmatpush.bf16.msra.mxu2 %v2673_v5  ;;  %1576 = vmatpush.bf16.msra.mxu3 %v2785_v21  ;;  %v2753_v63 = vor.u32 %v3261_v41, %v2752_v40  ;;  %v2629_v46 = vor.u32 %v3227_v42, %v2626_v59  ;;  %v2976_v5 = vld [vmem:[#allocation11 + $0xf0] sm:$0xf]  ;;  %v3315_v21 = vld [vmem:[#allocation11 + $0xe4] sm:$0xf0]  ;;  %v3345_v42 = vld [vmem:[#allocation11 + $0x1d4] sm:$0xf0] }
 0x309   :  { %v2977_v19 = vor.u32 %v3317_v6, %v2976_v5  ;;  %v2969_v33 = vor.u32 %v3315_v21, %v2968_v20  ;;  %v3088_v40 = vld [vmem:[#allocation11 + $0x1d0] sm:$0xf]  ;;  %v3329_v59 = vld [vmem:[#allocation11 + $0x154] sm:$0xf0]  ;;  %v3291_v5 = vld [vmem:[#allocation11 + $0x24] sm:$0xf0] }
 0x30a   :  { %v2978_v20 = vld [vmem:[#allocation11 + $0xf8] sm:$0xf0]  ;;  %v3314_v21 = vld [vmem:[#allocation11 + $0xe4] sm:$0xf]  ;;  %v2856_v24 = vld [vmem:[#allocation11] sm:$0xf] }
 0x30b   :  { %1586 = vmatpush.bf16.msrb.mxu0 %v2709_v50  ;;  %1599 = vmatpush.bf16.msrb.mxu1 %v2837_v51  ;;  %v2757_v50 = vor.u32 %v3259_v44, %v2754_v45  ;;  %v3257_v51 = vld [vmem:[#allocation10 + $0x114] sm:$0xf0]  ;;  %v2952_v45 = vld [vmem:[#allocation11 + $0xc0] sm:$0xf]  ;;  %v2954_v47 = vld [vmem:[#allocation11 + $0xc8] sm:$0xf0] }
 0x30c   :  { %1563 = vmatpush.bf16.msra.mxu2 %v2657_v17  ;;  %1577 = vmatpush.bf16.msra.mxu3 %v2769_v31  ;;  %v2737_v57 = vor.u32 %v3257_v51, %v2736_v49  ;;  %v3032_v31 = vld [vmem:[#allocation11 + $0x160] sm:$0xf]  ;;  %v3089_v49 = vor.u32 %v3345_v42, %v3088_v40  ;;  %v3325_v40 = vld [vmem:[#allocation11 + $0x134] sm:$0xf0]  ;;  %v3298_v42 = vld [vmem:[#allocation11 + $0x64] sm:$0xf] }
 0x30d   :  { %v3033_v41 = vor.u32 %v3331_v32, %v3032_v31  ;;  %v3080_v51 = vld [vmem:[#allocation11 + $0x1c0] sm:$0xf] }
 0x30f   :  { %1587 = vmatpush.bf16.msrb.mxu0 %v2693_v0  ;;  %1600 = vmatpush.bf16.msrb.mxu1 %v2821_v2  ;;  %v996_v0 = vperm.slane %v993_v61, 1  ;;  %v3072_v61 = vld [vmem:[#allocation11 + $0x1b0] sm:$0xf] }
 0x310   :  { %1564 = vmatpush.bf16.msra.mxu2 %v2641_v30  ;;  %1578 = vmatpush.bf16.msra.mxu3 %v2753_v63  ;;  %v3347_v30 = vld [vmem:[#allocation11 + $0x1e4] sm:$0xf0]  ;;  %v2897_v63 = vor.u32 %v3297_v38, %v2896_v37  ;;  %v2962_v37 = vld [vmem:[#allocation11 + $0xd8] sm:$0xf0] }
 0x313   :  { %1588 = vmatpush.bf16.msrb.mxu0 %v2677_v10  ;;  %1601 = vmatpush.bf16.msrb.mxu1 %v2805_v13  ;;  %v3040_v13 = vld [vmem:[#allocation11 + $0x170] sm:$0xf] }
 0x314   :  { %1565 = vmatpush.bf16.msra.mxu2 %v2625_v43  ;;  %1579 = vmatpush.bf16.msra.mxu3 %v2737_v57  ;;  %v3041_v27 = vor.u32 %v3333_v14, %v3040_v13  ;;  %v3024_v43 = vld [vmem:[#allocation11 + $0x150] sm:$0xf] }
 0x315   :  { %v2880_v57 = vld [vmem:[#allocation11 + $0x30] sm:$0xf] }
 0x317   :  { %1589 = vmatpush.bf16.msrb.mxu0 %v2661_v22  ;;  %1602 = vmatpush.bf16.msrb.mxu1 %v2789_v26  ;;  %v2913_v22 = vor.u32 %v3301_v8, %v2912_v7  ;;  %v3096_v26 = vld [vmem:[#allocation11 + $0x1e0] sm:$0xf]  ;;  %v2928_v8 = vld [vmem:[#allocation11 + $0x90] sm:$0xf] }
 0x318   :  { %1566 = vmatpush.bf16.msra.mxu2 %v2609_v56  ;;  %v3309_v56 = vld [vmem:[#allocation11 + $0xb4] sm:$0xf0] }
 0x31b   :  { %1590 = vmatpush.bf16.msrb.mxu0 %v2645_v35  ;;  %1603 = vmatpush.bf16.msrb.mxu1 %v2773_v39  ;;  %v3313_v35 = vld [vmem:[#allocation11 + $0xd4] sm:$0xf0]  ;;  %v3097_v39 = vor.u32 %v3347_v30, %v3096_v26  ;;  %v3016_v26 = vld [vmem:[#allocation11 + $0x140] sm:$0xf]  ;;  %v2914_v30 = vld [vmem:[#allocation11 + $0x78] sm:$0xf0] }
 0x31c   :  { %v2961_v44 = vor.u32 %v3313_v35, %v2960_v34  ;;  %v3339_v34 = vld [vmem:[#allocation11 + $0x1a4] sm:$0xf0] }
 0x31f   :  { %1591 = vmatpush.bf16.msrb.mxu0 %v2629_v46  ;;  %1604 = vmatpush.bf16.msrb.mxu1 %v2757_v50  ;;  %v3311_v46 = vld [vmem:[#allocation11 + $0xc4] sm:$0xf0]  ;;  %v3025_v50 = vor.u32 %v3329_v59, %v3024_v43  ;;  %v2906_v43 = vld [vmem:[#allocation11 + $0x68] sm:$0xf0] }
 0x320   :  { %v2953_v53 = vor.u32 %v3311_v46, %v2952_v45  ;;  %v2909_v59 = vor.u32 %v3298_v42, %v2906_v43  ;;  %v3337_v45 = vld [vmem:[#allocation11 + $0x194] sm:$0xf0]  ;;  %v3310_v46 = vld [vmem:[#allocation11 + $0xc4] sm:$0xf]  ;;  %v2866_v42 = vld [vmem:[#allocation11 + $0x18] sm:$0xf0] }
 0x321   :  { %v2957_v48 = vor.u32 %v3310_v46, %v2954_v47  ;;  %v3328_v43 = vld [vmem:[#allocation11 + $0x154] sm:$0xf]  ;;  %v3074_v46 = vld [vmem:[#allocation11 + $0x1b8] sm:$0xf0]  ;;  %v3747_v47 = vld [vmem:[%s3772_s13] sm:$0xf] }
 0x323   :  { %1592 = vmatpush.bf16.msrb.mxu0 %v2613_v58  ;;  %1605 = vmatpush.bf16.msrb.mxu1 %v2741_v60  ;;  %v3293_v58 = vld [vmem:[#allocation11 + $0x34] sm:$0xf0]  ;;  %v3081_v60 = vor.u32 %v3343_v52, %v3080_v51  ;;  %v3296_v52 = vld [vmem:[#allocation11 + $0x54] sm:$0xf] }
 0x383   :  { %v1088_v2 = vpop.f32.mrf.mxu0  ;;  %v1101_v3 = vpop.f32.mrf.mxu1 }
 0x384   :  { %v1089_v1 = vadd.f32 %v1088_v2, %v995_v62  ;;  %v1102_v4 = vadd.f32 %v1101_v3, %v996_v0  ;;  %v3341_v62 = vld [vmem:[#allocation11 + $0x1b4] sm:$0xf0]  ;;  %v2945_v0 = vor.u32 %v3309_v56, %v2944_v54  ;;  %v2936_v2 = vld [vmem:[#allocation11 + $0xa0] sm:$0xf]  ;;  %v2881_v3 = vor.u32 %v3293_v58, %v2880_v57  ;;  %v3335_v56 = vld [vmem:[#allocation11 + $0x184] sm:$0xf0] }
 0x385   :  { %v3073_v6 = vor.u32 %v3341_v62, %v3072_v61  ;;  %v3308_v58 = vld [vmem:[#allocation11 + $0xb4] sm:$0xf] }
 0x386   :  { %vm1105_vm8 = vcmp.gt.f32.partialorder %v1089_v1, 0.0  ;;  %v1107_v10 = vmul.f32 0.2, %v1089_v1  ;;  %vm1106_vm9 = vcmp.gt.f32.partialorder %v1102_v4, 0.0  ;;  %v1108_v11 = vmul.f32 0.2, %v1102_v4 }
 0x387   :  { %v3348_v61 = vld [vmem:[#allocation11 + $0x1f4] sm:$0xf] }
 0x388   :  { %v1109_v15 = vsel %vm1105_vm8, %v1089_v1, %v1107_v10  ;;  %v1110_v16 = vsel %vm1106_vm9, %v1102_v4, %v1108_v11  ;;  %v3307_v1 = vld [vmem:[#allocation11 + $0xa4] sm:$0xf0]  ;;  %v2872_v4 = vld [vmem:[#allocation11 + $0x20] sm:$0xf]  ;;  %v3305_v10 = vld [vmem:[#allocation11 + $0x94] sm:$0xf0] }
 0x389   :  { %v3732_v17 = vpack.c.bf16 %v1109_v15, %v1109_v15  ;;  %v3734_v18 = vpack.c.bf16 %v1110_v16, %v1110_v16  ;;  %v2937_v7 = vor.u32 %v3307_v1, %v2936_v2  ;;  %v2873_v9 = vor.u32 %v3291_v5, %v2872_v4  ;;  %v2864_v11 = vld [vmem:[#allocation11 + $0x10] sm:$0xf]  ;;  %v2920_v15 = vld [vmem:[#allocation11 + $0x80] sm:$0xf]  ;;  %v3303_v16 = vld [vmem:[#allocation11 + $0x84] sm:$0xf0] }
 0x38a   :  { %v2929_v13 = vor.u32 %v3305_v10, %v2928_v8  ;;  %v2865_v14 = vor.u32 %v3289_v12, %v2864_v11  ;;  %v2992_v2 = vld [vmem:[#allocation11 + $0x110] sm:$0xf]  ;;  %v3294_v5 = vld [vmem:[#allocation11 + $0x44] sm:$0xf]  ;;  %v3098_v12 = vld [vmem:[#allocation11 + $0x1e8] sm:$0xf0] }
 0x38b   :  { %v1090_v28 = vpop.f32.mrf.mxu0  ;;  %v1103_v29 = vpop.f32.mrf.mxu1  ;;  %1515 = vmatmul.bf16.vlgmr.msrb.gmra.mxu2 %v3732_v17  ;;  %1528 = vmatmul.bf16.vlgmr.msrb.gmra.mxu3 %v3734_v18  ;;  %v3306_v8 = vld [vmem:[#allocation11 + $0xa4] sm:$0xf] }
 0x38c   :  { %1541 = vmatmul.bf16.vlgmr.msra.gmra.mxu0 %v3732_v17  ;;  %1554 = vmatmul.bf16.vlgmr.msra.gmra.mxu1 %v3734_v18  ;;  %v3327_v28 = vld [vmem:[#allocation11 + $0x144] sm:$0xf0]  ;;  %v3300_v29 = vld [vmem:[#allocation11 + $0x74] sm:$0xf]  ;;  %v3346_v10 = vld [vmem:[#allocation11 + $0x1e4] sm:$0xf] }
 0x38d   :  { %2030 = vmatpush.bf16.msrb.mxu3 %v2977_v19  ;;  %2017 = vmatpush.bf16.msrb.mxu2 %v2913_v22  ;;  %v3316_v19 = vld [vmem:[#allocation11 + $0xf4] sm:$0xf]  ;;  %v2970_v22 = vld [vmem:[#allocation11 + $0xe8] sm:$0xf0]  ;;  %v3017_v31 = vor.u32 %v3327_v28, %v3016_v26  ;;  %v2917_v32 = vor.u32 %v3300_v29, %v2914_v30  ;;  %v3290_v29 = vld [vmem:[#allocation11 + $0x24] sm:$0xf] }
 0x38e   :  { %2056 = vmatpush.bf16.msra.mxu1 %v3105_v25  ;;  %2043 = vmatpush.bf16.msra.mxu0 %v3041_v27  ;;  %v2973_v23 = vor.u32 %v3314_v21, %v2970_v22  ;;  %v3287_v25 = vld [vmem:[#allocation11 + $0x4] sm:$0xf0]  ;;  %v3042_v21 = vld [vmem:[#allocation11 + $0x178] sm:$0xf0]  ;;  %v2874_v30 = vld [vmem:[#allocation11 + $0x28] sm:$0xf0] }
 0x38f   :  { %v2857_v27 = vor.u32 %v3287_v25, %v2856_v24  ;;  %v2930_v24 = vld [vmem:[#allocation11 + $0x98] sm:$0xf0]  ;;  %v3344_v25 = vld [vmem:[#allocation11 + $0x1d4] sm:$0xf] }
 0x391   :  { %2031 = vmatpush.bf16.msrb.mxu3 %v2969_v33  ;;  %2018 = vmatpush.bf16.msrb.mxu2 %v2905_v36  ;;  %v3064_v33 = vld [vmem:[#allocation11 + $0x1a0] sm:$0xf]  ;;  %v3312_v36 = vld [vmem:[#allocation11 + $0xd4] sm:$0xf] }
 0x392   :  { %2057 = vmatpush.bf16.msra.mxu1 %v3097_v39  ;;  %2044 = vmatpush.bf16.msra.mxu0 %v3033_v41  ;;  %v3065_v35 = vor.u32 %v3339_v34, %v3064_v33  ;;  %v2965_v38 = vor.u32 %v3312_v36, %v2962_v37  ;;  %v3008_v39 = vld [vmem:[#allocation11 + $0x130] sm:$0xf]  ;;  %v3034_v33 = vld [vmem:[#allocation11 + $0x168] sm:$0xf0]  ;;  %v3342_v37 = vld [vmem:[#allocation11 + $0x1c4] sm:$0xf] }
 0x393   :  { %v3009_v41 = vor.u32 %v3325_v40, %v3008_v39  ;;  %v2922_v36 = vld [vmem:[#allocation11 + $0x88] sm:$0xf0] }
 0x394   :  { %v3082_v39 = vld [vmem:[#allocation11 + $0x1c8] sm:$0xf0] }
 0x395   :  { %2032 = vmatpush.bf16.msrb.mxu3 %v2961_v44  ;;  %2019 = vmatpush.bf16.msrb.mxu2 %v2897_v63  ;;  %v3056_v44 = vld [vmem:[#allocation11 + $0x190] sm:$0xf]  ;;  %v3085_v40 = vor.u32 %v3342_v37, %v3082_v39 }
 0x396   :  { %2058 = vmatpush.bf16.msra.mxu1 %v3089_v49  ;;  %2045 = vmatpush.bf16.msra.mxu0 %v3025_v50  ;;  %v3057_v63 = vor.u32 %v3337_v45, %v3056_v44  ;;  %v3000_v49 = vld [vmem:[#allocation11 + $0x120] sm:$0xf]  ;;  %v3323_v50 = vld [vmem:[#allocation11 + $0x124] sm:$0xf0]  ;;  %v3026_v44 = vld [vmem:[#allocation11 + $0x158] sm:$0xf0] }
 0x397   :  { %v3001_v51 = vor.u32 %v3323_v50, %v3000_v49  ;;  %v3029_v45 = vor.u32 %v3328_v43, %v3026_v44  ;;  %v3286_v49 = vld [vmem:[#allocation11 + $0x4] sm:$0xf]  ;;  %v2858_v50 = vld [vmem:[#allocation11 + $0x8] sm:$0xf0] }
 0x399   :  { %2033 = vmatpush.bf16.msrb.mxu3 %v2953_v53  ;;  %2020 = vmatpush.bf16.msrb.mxu2 %v2889_v55  ;;  %v2898_v53 = vld [vmem:[#allocation11 + $0x58] sm:$0xf0]  ;;  %v3048_v55 = vld [vmem:[#allocation11 + $0x180] sm:$0xf] }
 0x39a   :  { %2059 = vmatpush.bf16.msra.mxu1 %v3081_v60  ;;  %2046 = vmatpush.bf16.msra.mxu0 %v3017_v31  ;;  %v2901_v54 = vor.u32 %v3296_v52, %v2898_v53  ;;  %v3049_v57 = vor.u32 %v3335_v56, %v3048_v55  ;;  %v2946_v60 = vld [vmem:[#allocation11 + $0xb8] sm:$0xf0]  ;;  %v3330_v31 = vld [vmem:[#allocation11 + $0x164] sm:$0xf]  ;;  %v2861_v52 = vor.u32 %v3286_v49, %v2858_v50  ;;  %v3018_v53 = vld [vmem:[#allocation11 + $0x148] sm:$0xf0] }
 0x39b   :  { %1567 = vmatmul.bf16.vlgmr.msra.gmra.mxu2 %v3732_v17  ;;  %1580 = vmatmul.bf16.vlgmr.msra.gmra.mxu3 %v3734_v18  ;;  %v2949_v62 = vor.u32 %v3308_v58, %v2946_v60  ;;  %v3037_v34 = vor.u32 %v3330_v31, %v3034_v33  ;;  %v3338_v55 = vld [vmem:[#allocation11 + $0x1a4] sm:$0xf]  ;;  %v3066_v56 = vld [vmem:[#allocation11 + $0x1a8] sm:$0xf0]  ;;  %v3324_v60 = vld [vmem:[#allocation11 + $0x134] sm:$0xf] }
 0x39c   :  { %1593 = vmatmul.bf16.vlgmr.msrb.gmra.mxu0 %v3732_v17  ;;  %1606 = vmatmul.bf16.vlgmr.msrb.gmra.mxu1 %v3734_v18  ;;  %v2921_v17 = vor.u32 %v3303_v16, %v2920_v15  ;;  %v2981_v18 = vor.u32 %v3316_v19, %v2978_v20  ;;  %v3319_v15 = vld [vmem:[#allocation11 + $0x104] sm:$0xf0]  ;;  %v3292_v16 = vld [vmem:[#allocation11 + $0x34] sm:$0xf]  ;;  %v2882_v19 = vld [vmem:[#allocation11 + $0x38] sm:$0xf0]  ;;  %v3069_v58 = vor.u32 %v3338_v55, %v3066_v56 }
 0x39d   :  { %2034 = vmatpush.bf16.msrb.mxu3 %v2945_v0  ;;  %2021 = vmatpush.bf16.msrb.mxu2 %v2881_v3  ;;  %v3106_v0 = vld [vmem:[#allocation11 + $0x1f8] sm:$0xf0]  ;;  %v3321_v3 = vld [vmem:[#allocation11 + $0x114] sm:$0xf0] }
 0x39e   :  { %2060 = vmatpush.bf16.msra.mxu1 %v3073_v6  ;;  %2047 = vmatpush.bf16.msra.mxu0 %v3009_v41  ;;  %v3109_v1 = vor.u32 %v3348_v61, %v3106_v0  ;;  %v2993_v4 = vor.u32 %v3321_v3, %v2992_v2  ;;  %v2890_v6 = vld [vmem:[#allocation11 + $0x48] sm:$0xf0]  ;;  %v3288_v41 = vld [vmem:[#allocation11 + $0x14] sm:$0xf]  ;;  %v3010_v61 = vld [vmem:[#allocation11 + $0x138] sm:$0xf0] }
 0x39f   :  { %v3336_v0 = vld [vmem:[#allocation11 + $0x194] sm:$0xf]  ;;  %v3058_v2 = vld [vmem:[#allocation11 + $0x198] sm:$0xf0]  ;;  %v3322_v3 = vld [vmem:[#allocation11 + $0x124] sm:$0xf] }
 0x3a1   :  { %2035 = vmatpush.bf16.msrb.mxu3 %v2937_v7  ;;  %2022 = vmatpush.bf16.msrb.mxu2 %v2873_v9  ;;  %v2893_v7 = vor.u32 %v3294_v5, %v2890_v6  ;;  %v2938_v9 = vld [vmem:[#allocation11 + $0xa8] sm:$0xf0]  ;;  %v3061_v5 = vor.u32 %v3336_v0, %v3058_v2 }
 0x3a2   :  { %2061 = vmatpush.bf16.msra.mxu1 %v3065_v35  ;;  %2048 = vmatpush.bf16.msra.mxu0 %v3001_v51  ;;  %v2941_v11 = vor.u32 %v3306_v8, %v2938_v9  ;;  %v3302_v35 = vld [vmem:[#allocation11 + $0x84] sm:$0xf]  ;;  %v3002_v6 = vld [vmem:[#allocation11 + $0x128] sm:$0xf0] }
 0x3a3   :  { %v3326_v51 = vld [vmem:[#allocation11 + $0x144] sm:$0xf]  ;;  %v3050_v9 = vld [vmem:[#allocation11 + $0x188] sm:$0xf0] }
 0x3a4   :  { %v3334_v8 = vld [vmem:[#allocation11 + $0x184] sm:$0xf] }
 0x3a5   :  { %2036 = vmatpush.bf16.msrb.mxu3 %v2929_v13  ;;  %2023 = vmatpush.bf16.msrb.mxu2 %v2865_v14  ;;  %v2984_v13 = vld [vmem:[#allocation11 + $0x100] sm:$0xf]  ;;  %v3101_v14 = vor.u32 %v3346_v10, %v3098_v12  ;;  %v1179_v10 = vperm.slane %v3747_v47, 0 }
 0x3a6   :  { %2062 = vmatpush.bf16.msra.mxu1 %v3057_v63  ;;  %2049 = vmatpush.bf16.msra.mxu0 %v2993_v4  ;;  %v2985_v20 = vor.u32 %v3319_v15, %v2984_v13  ;;  %v3340_v63 = vld [vmem:[#allocation11 + $0x1b4] sm:$0xf]  ;;  %v3053_v15 = vor.u32 %v3334_v8, %v3050_v9 }
 0x3a7   :  { %v3320_v13 = vld [vmem:[#allocation11 + $0x114] sm:$0xf] }
 0x3a9   :  { %2037 = vmatpush.bf16.msrb.mxu3 %v2921_v17  ;;  %2024 = vmatpush.bf16.msrb.mxu2 %v2857_v27  ;;  %v2885_v17 = vor.u32 %v3292_v16, %v2882_v19  ;;  %v3090_v27 = vld [vmem:[#allocation11 + $0x1d8] sm:$0xf0] }
 0x3aa   :  { %2063 = vmatpush.bf16.msra.mxu1 %v3049_v57  ;;  %2050 = vmatpush.bf16.msra.mxu0 %v2985_v20  ;;  %v3093_v28 = vor.u32 %v3344_v25, %v3090_v27  ;;  %v1180_v57 = vperm.slane %v3747_v47, 1  ;;  %v3318_v27 = vld [vmem:[#allocation11 + $0x104] sm:$0xf] }
 0x3ad   :  { %2082 = vmatpush.bf16.msra.mxu3 %v2981_v18  ;;  %2069 = vmatpush.bf16.msra.mxu2 %v2917_v32  ;;  %v3332_v18 = vld [vmem:[#allocation11 + $0x174] sm:$0xf]  ;;  %v2877_v32 = vor.u32 %v3290_v29, %v2874_v30 }
 0x3ae   :  { %2108 = vmatpush.bf16.msrb.mxu1 %v3109_v1  ;;  %v3045_v22 = vor.u32 %v3332_v18, %v3042_v21 }
 0x3b0   :  { %2095 = vmatpush.bf16.msrb.mxu0 %v3045_v22 }
 0x3b1   :  { %2083 = vmatpush.bf16.msra.mxu3 %v2973_v23  ;;  %2070 = vmatpush.bf16.msra.mxu2 %v2909_v59  ;;  %v3304_v23 = vld [vmem:[#allocation11 + $0x94] sm:$0xf]  ;;  %v2869_v59 = vor.u32 %v3288_v41, %v2866_v42 }
 0x3b2   :  { %2109 = vmatpush.bf16.msrb.mxu1 %v3101_v14  ;;  %v2933_v26 = vor.u32 %v3304_v23, %v2930_v24  ;;  %v2994_v14 = vld [vmem:[#allocation11 + $0x118] sm:$0xf0] }
 0x3b3   :  { %v2997_v18 = vor.u32 %v3320_v13, %v2994_v14 }
 0x3b4   :  { %2096 = vmatpush.bf16.msrb.mxu0 %v3037_v34  ;;  %v1182_v34 = vperm.slane %v3747_v47, 3 }
 0x3b5   :  { %2084 = vmatpush.bf16.msra.mxu3 %v2965_v38  ;;  %2071 = vmatpush.bf16.msra.mxu2 %v2901_v54  ;;  %v2925_v38 = vor.u32 %v3302_v35, %v2922_v36  ;;  %v3021_v54 = vor.u32 %v3326_v51, %v3018_v53  ;;  %v1691_v53 = vld [vmem:[%s3774_s15] sm:$0x3]  ;;  %s3557_s15 = smov [#allocation13]  }
 0x3b6   :  { %2110 = vmatpush.bf16.msrb.mxu1 %v3093_v28  ;;  %v2986_v28 = vld [vmem:[#allocation11 + $0x108] sm:$0xf0]  ;;  %v1693_v55 = vperm.slane %v1691_v53, 0  ;;  %s2130_s23 = sshll.u32 %s3557_s15, 4  ;;  %s2131_s23 = int_to_ptr.vmem [resolvable:$true] %s2130_s23 }
 0x3b7   :  { %v2989_v30 = vor.u32 %v3318_v27, %v2986_v28 }
 0x3b8   :  { %2097 = vmatpush.bf16.msrb.mxu0 %v3029_v45 }
 0x3b9   :  { %2085 = vmatpush.bf16.msra.mxu3 %v2957_v48  ;;  %2072 = vmatpush.bf16.msra.mxu2 %v2893_v7  ;;  %v3077_v48 = vor.u32 %v3340_v63, %v3074_v46 }
 0x3ba   :  { %2111 = vmatpush.bf16.msrb.mxu1 %v3085_v40 }
 0x3bc   :  { %2098 = vmatpush.bf16.msrb.mxu0 %v3021_v54 }
 0x3bd   :  { %2086 = vmatpush.bf16.msra.mxu3 %v2949_v62  ;;  %2073 = vmatpush.bf16.msra.mxu2 %v2885_v17  ;;  %v3013_v62 = vor.u32 %v3324_v60, %v3010_v61 }
 0x3be   :  { %2112 = vmatpush.bf16.msrb.mxu1 %v3077_v48 }
 0x3c0   :  { %2099 = vmatpush.bf16.msrb.mxu0 %v3013_v62 }
 0x3c1   :  { %2087 = vmatpush.bf16.msra.mxu3 %v2941_v11  ;;  %2074 = vmatpush.bf16.msra.mxu2 %v2877_v32  ;;  %v3005_v11 = vor.u32 %v3322_v3, %v3002_v6 }
 0x3c2   :  { %2113 = vmatpush.bf16.msrb.mxu1 %v3069_v58 }
 0x3c4   :  { %2100 = vmatpush.bf16.msrb.mxu0 %v3005_v11 }
 0x3c5   :  { %2088 = vmatpush.bf16.msra.mxu3 %v2933_v26  ;;  %2075 = vmatpush.bf16.msra.mxu2 %v2869_v59 }
 0x3c6   :  { %2114 = vmatpush.bf16.msrb.mxu1 %v3061_v5  ;;  %v1694_v5 = vperm.slane %v1691_v53, 1 }
 0x3c8   :  { %2101 = vmatpush.bf16.msrb.mxu0 %v2997_v18 }
 0x3c9   :  { %2089 = vmatpush.bf16.msra.mxu3 %v2925_v38  ;;  %2076 = vmatpush.bf16.msra.mxu2 %v2861_v52  ;;  %v1181_v38 = vperm.slane %v3747_v47, 2 }
 0x3ca   :  { %2115 = vmatpush.bf16.msrb.mxu1 %v3053_v15 }
 0x3cc   :  { %2102 = vmatpush.bf16.msrb.mxu0 %v2989_v30 }
 0x409   :  { %v1542_v1 = vpop.f32.mrf.mxu0  ;;  %v1555_v4 = vpop.f32.mrf.mxu1 }
 0x40a   :  { %v1543_v7 = vadd.f32 %v1542_v1, %v1180_v57 }
 0x40c   :  { %v1556_v12 = vadd.f32 %v1555_v4, %v1543_v7 }
 0x40e   :  { %vm1612_vm10 = vcmp.gt.f32.partialorder %v1556_v12, 0.0  ;;  %v1616_v16 = vmul.f32 0.2, %v1556_v12  ;;  %v1516_v19 = vpop.f32.mrf.mxu2  ;;  %v1529_v20 = vpop.f32.mrf.mxu3 }
 0x40f   :  { %v1517_v17 = vadd.f32 %v1516_v19, %v1179_v10 }
 0x410   :  { %v1620_v21 = vsel %vm1612_vm10, %v1556_v12, %v1616_v16 }
 0x411   :  { %v1624_v22 = vpack.c.bf16 %v1620_v21, %v1620_v21  ;;  %v1530_v23 = vadd.f32 %v1529_v20, %v1517_v17  ;;  %v1544_v24 = vpop.f32.mrf.mxu0  ;;  %v1557_v25 = vpop.f32.mrf.mxu1 }
 0x413   :  { %vm1611_vm11 = vcmp.gt.f32.partialorder %v1530_v23, 0.0  ;;  %v1615_v26 = vmul.f32 0.2, %v1530_v23  ;;  %2038 = vmatmul.bf16.vlgmr.msrb.gmra.mxu3 %v1624_v22 }
 0x415   :  { %v1619_v29 = vsel %vm1611_vm11, %v1530_v23, %v1615_v26 }
 0x416   :  { %v1623_v31 = vpack.c.bf16 %v1619_v29, %v1619_v29  ;;  %v1518_v32 = vpop.f32.mrf.mxu2  ;;  %v1531_v33 = vpop.f32.mrf.mxu3 }
 0x418   :  { %2025 = vmatmul.bf16.vlgmr.msrb.gmra.mxu2 %v1623_v31 }
 0x419   :  { %v1594_v35 = vpop.f32.mrf.mxu0  ;;  %v1607_v36 = vpop.f32.mrf.mxu1 }
 0x41a   :  { %v1595_v37 = vadd.f32 %v1594_v35, %v1182_v34 }
 0x41c   :  { %v1608_v39 = vadd.f32 %v1607_v36, %v1595_v37 }
 0x41e   :  { %vm1614_vm12 = vcmp.gt.f32.partialorder %v1608_v39, 0.0  ;;  %v1618_v40 = vmul.f32 0.2, %v1608_v39  ;;  %v1568_v41 = vpop.f32.mrf.mxu2  ;;  %v1581_v42 = vpop.f32.mrf.mxu3 }
 0x41f   :  { %v1569_v43 = vadd.f32 %v1568_v41, %v1181_v38 }
 0x420   :  { %v1622_v59 = vsel %vm1614_vm12, %v1608_v39, %v1618_v40 }
 0x421   :  { %v1626_v44 = vpack.c.bf16 %v1622_v59, %v1622_v59  ;;  %v1582_v45 = vadd.f32 %v1581_v42, %v1569_v43  ;;  %v1596_v63 = vpop.f32.mrf.mxu0  ;;  %v1609_v46 = vpop.f32.mrf.mxu1 }
 0x423   :  { %vm1613_vm13 = vcmp.gt.f32.partialorder %v1582_v45, 0.0  ;;  %v1617_v48 = vmul.f32 0.2, %v1582_v45  ;;  %2064 = vmatmul.bf16.vlgmr.msra.gmra.mxu1 %v1626_v44  ;;  %2090 = vmatmul.bf16.vlgmr.msra.gmra.mxu3 %v1624_v22 }
 0x425   :  { %v1621_v49 = vsel %vm1613_vm13, %v1582_v45, %v1617_v48 }
 0x426   :  { %v1625_v50 = vpack.c.bf16 %v1621_v49, %v1621_v49  ;;  %v1570_v51 = vpop.f32.mrf.mxu2  ;;  %v1583_v52 = vpop.f32.mrf.mxu3 }
 0x428   :  { %2051 = vmatmul.bf16.vlgmr.msra.gmra.mxu0 %v1625_v50  ;;  %2077 = vmatmul.bf16.vlgmr.msra.gmra.mxu2 %v1623_v31 }
 0x433   :  { %2116 = vmatmul.bf16.vlgmr.msrb.gmra.mxu1 %v1626_v44 }
 0x438   :  { %2103 = vmatmul.bf16.vlgmr.msrb.gmra.mxu0 %v1625_v50 }
 0x496   :  { %v2039_v47 = vpop.f32.mrf.mxu3 }
 0x49b   :  { %v2026_v54 = vpop.f32.mrf.mxu2 }
 0x49c   :  { %v2027_v57 = vadd.f32 %v2026_v54, %v1693_v55 }
 0x49e   :  { %v2041_v56 = vpop.f32.mrf.mxu3  ;;  %v2040_v61 = vadd.f32 %v2039_v47, %v2027_v57 }
 0x4a0   :  { %v2065_v58 = vpop.f32.mrf.mxu1 }
 0x4a3   :  { %v2028_v60 = vpop.f32.mrf.mxu2 }
 0x4a5   :  { %v2052_v62 = vpop.f32.mrf.mxu0 }
 0x4a6   :  { %v2053_v0 = vadd.f32 %v2052_v62, %v2040_v61  ;;  %v2091_v2 = vpop.f32.mrf.mxu3 }
 0x4a8   :  { %v2066_v3 = vadd.f32 %v2065_v58, %v2053_v0  ;;  %v2067_v1 = vpop.f32.mrf.mxu1 }
 0x4aa   :  { %2121 = vst [vmem:[#allocation13] sm:$0xff] %v2066_v3 }
 0x4ab   :  { %v2078_v4 = vpop.f32.mrf.mxu2 }
 0x4ac   :  { %v2079_v8 = vadd.f32 %v2078_v4, %v1694_v5 }
 0x4ad   :  { %v2054_v6 = vpop.f32.mrf.mxu0 }
 0x4ae   :  { %v2093_v7 = vpop.f32.mrf.mxu3  ;;  %v2092_v11 = vadd.f32 %v2091_v2, %v2079_v8 }
 0x4b0   :  { %v2117_v9 = vpop.f32.mrf.mxu1 }
 0x4b3   :  { %v2080_v10 = vpop.f32.mrf.mxu2 }
 0x4b5   :  { %v2104_v12 = vpop.f32.mrf.mxu0 }
 0x4b6   :  { %v2105_v13 = vadd.f32 %v2104_v12, %v2092_v11 }
 0x4b8   :  { %v2118_v14 = vadd.f32 %v2117_v9, %v2105_v13  ;;  %v2119_v15 = vpop.f32.mrf.mxu1 }
 0x4ba   :  { %2122 = vst [vmem:[#allocation13 + $0x8] sm:$0xff] %v2118_v14 }
 0x4bb   :  { %2135 = dma.vmem_to_hbm [thread:$0]  %s2131_s23, 256, %s2133_s18, [#allocation4]  }
 0x4bd   :  { %v2106_v16 = vpop.f32.mrf.mxu0 }
 0x4be   :  { %3544 = dma.done.wait [#allocation4], 256  }
 0x4bf   :  { %3545 = vsyncadd [#allocation4], 4294967040 }
 0x4c0   :  { %2144 = vsyncpa [#allocation3], 1 }
 0x4c1   :  { %2145 = vsyncpa [#allocation6], 1 }
 0x4c2   :  { %2146 = vsyncpa [#allocation9], 1 }
 0x4c3   :  { %2147 = vsyncpa [#allocation12], 1 }
 0x4c4   :  { %2148 = vsyncpa [#allocation4], 1 }

</bundles_post_ra>
